<compile_context>
chip_gen: v7x
topology: tpu7x:2x2x1
jax: 0.10.0
libtpu: 0.0.40
codegen_flags: <defaults>
</compile_context>

<pallas_src>
import jax
import jax.numpy as jnp
from jax import lax
from jax.experimental import pallas as pl
from jax.experimental.pallas import tpu as pltpu


def _tail_kernel(xp_ref, w_ref, b_ref, o_ref):
    # xp_ref : (1, Cin, H+2, W+2)  zero-padded input planes (VMEM)
    # w_ref  : (3*3*Cin*3,)        fused conv weights, layout [ky][kx][ci][co] (SMEM)
    # b_ref  : (3,)                fused bias (SMEM)
    # o_ref  : (1, 3, H, W)        output (VMEM)
    Cin = xp_ref.shape[1]
    H = o_ref.shape[2]
    W = o_ref.shape[3]

    # One lane-dense (H, W) f32 accumulator per output channel, initialized
    # with the fused bias (scalar broadcast from SMEM).
    acc = [jnp.zeros((H, W), jnp.float32) + b_ref[o] for o in range(3)]

    for c in range(Cin):
        xc = xp_ref[0, c]                                # (H+2, W+2), loaded once
        # hoist the lane (W) shifts: 3 column-shifted views per input channel
        cols = [xc[:, kx:kx + W] for kx in range(3)]     # 3 x (H+2, W)
        for ky in range(3):
            for kx in range(3):
                tap = cols[kx][ky:ky + H, :]             # (H, W) shifted window
                base = ((ky * 3 + kx) * Cin + c) * 3
                for o in range(3):
                    acc[o] = acc[o] + w_ref[base + o] * tap   # VPU scalar MAC

    for o in range(3):
        o_ref[0, o] = jnp.clip(acc[o], -1.0, 1.0).astype(o_ref.dtype)


def tail_forward(x_nchw, w1, b1, w2, b2):
    """TTSR Tail forward.

    x_nchw : (N, Cin, H, W)   PyTorch NCHW layout (no transpose needed)
    w1     : (3, 3, Cin, Cmid) conv3x3 weights (HWIO)
    b1     : (Cmid,)
    w2     : (Cmid, 3)         conv1x1 weights
    b2     : (3,)
    returns (N, 3, H, W)
    """
    N, Cin, H, W = x_nchw.shape

    # Algebraic fusion of the 1x1 conv into the 3x3 conv (exact up to rounding).
    hp = lax.Precision.HIGHEST
    w_f = jnp.einsum("hwim,mo->hwio", w1, w2, precision=hp)      # (3, 3, Cin, 3)
    b_f = jnp.dot(b1, w2, precision=hp) + b2                     # (3,)
    w_flat = w_f.reshape(-1).astype(jnp.float32)
    b_f = b_f.astype(jnp.float32)

    # TODO(synk): fold this zero-pad into the kernel (masked edge taps) to save
    # one HBM round trip of the input; kept as a single XLA op for simplicity.
    xp = jnp.pad(x_nchw, ((0, 0), (0, 0), (1, 1), (1, 1)))

    # TODO(synk): for production sizes (n_feats=64, large H) add a row-strip
    # grid axis with a 1-row halo (and bf16 activations) so the working set
    # fits v7x's 64 MiB VMEM and each TensorCore gets enough steps to pipeline.
    return pl.pallas_call(
        _tail_kernel,
        out_shape=jax.ShapeDtypeStruct((N, 3, H, W), x_nchw.dtype),
        grid=(N,),
        in_specs=[
            pl.BlockSpec((1, Cin, H + 2, W + 2), lambda n: (n, 0, 0, 0)),
            pl.BlockSpec(memory_space=pltpu.MemorySpace.SMEM),
            pl.BlockSpec(memory_space=pltpu.MemorySpace.SMEM),
        ],
        out_specs=pl.BlockSpec((1, 3, H, W), lambda n: (n, 0, 0, 0)),
        compiler_params=pltpu.CompilerParams(
            dimension_semantics=("parallel",)),
    )(xp, w_flat, b_f)


def _reference(x_nchw, w1, b1, w2, b2):
    # pure-JAX reference of the UNFUSED module (conv3x3 -> conv1x1 -> clamp)
    hp = lax.Precision.HIGHEST
    dn1 = lax.conv_dimension_numbers(x_nchw.shape, w1.shape,
                                     ("NCHW", "HWIO", "NCHW"))
    y = lax.conv_general_dilated(x_nchw, w1, (1, 1), "SAME",
                                 dimension_numbers=dn1, precision=hp)
    y = y + b1.reshape(1, -1, 1, 1)
    w2k = w2.reshape(1, 1, *w2.shape)
    dn2 = lax.conv_dimension_numbers(y.shape, w2k.shape,
                                     ("NCHW", "HWIO", "NCHW"))
    z = lax.conv_general_dilated(y, w2k, (1, 1), "SAME",
                                 dimension_numbers=dn2, precision=hp)
    z = z + b2.reshape(1, -1, 1, 1)
    return jnp.clip(z, -1.0, 1.0)


if __name__ == "__main__":
    # small shapes consistent with the module: batch=2, n_feats=4, spatial=16
    N, n_feats, H, W = 2, 4, 16, 16
    n_mid = n_feats // 2

    key = jax.random.PRNGKey(0)
    kx, kw1, kb1, kw2, kb2 = jax.random.split(key, 5)

    # NCHW input, exactly like the PyTorch module
    x = jax.random.uniform(kx, (N, n_feats, H, W), jnp.float32, -1.0, 1.0)

    # deterministic synthetic parameters (conv3x3: HWIO; conv1x1: (Cin, Cout))
    w1 = jax.random.normal(kw1, (3, 3, n_feats, n_mid), jnp.float32) * 0.2
    b1 = jax.random.normal(kb1, (n_mid,), jnp.float32) * 0.05
    w2 = jax.random.normal(kw2, (n_mid, 3), jnp.float32) * 0.2
    b2 = jax.random.normal(kb2, (3,), jnp.float32) * 0.05

    out = tail_forward(x, w1, b1, w2, b2)
    jax.block_until_ready(out)

    ref = _reference(x, w1, b1, w2, b2)
    assert out.shape == (N, 3, H, W)
    assert jnp.allclose(out, ref, atol=1e-5, rtol=1e-5), (
        float(jnp.max(jnp.abs(out - ref))))

    print("KERNEL_OK")
</pallas_src>

<mosaic_0001>
module attributes {stable_mosaic.version = 11 : i64} {
  func.func @_tail_kernel(%arg0: i32, %arg1: memref<1x4x18x18xf32, #tpu.memory_space<vmem>>, %arg2: memref<108xf32, #tpu.memory_space<smem>>, %arg3: memref<3xf32, #tpu.memory_space<smem>>, %arg4: memref<1x3x16x16xf32, #tpu.memory_space<vmem>>) attributes {dimension_semantics = [#tpu.dimension_semantics<parallel>], iteration_bounds = array<i64: 2>, scalar_prefetch = 0 : i64, scratch_operands = 0 : i64, tpu.core_type = #tpu.core_type<tc>, window_params = [{transform_indices = @transform_0, window_bounds = array<i64: 1, 4, 18, 18>}, {transform_indices = @transform_1, window_bounds = array<i64: 108>}, {transform_indices = @transform_2, window_bounds = array<i64: 3>}, {transform_indices = @transform_3, window_bounds = array<i64: 1, 3, 16, 16>}]} {
    %cst = arith.constant 0.000000e+00 : f32
    %0 = vector.broadcast %cst : f32 to vector<16x16xf32>
    %c0 = arith.constant 0 : index
    %1 = memref.load %arg3[%c0] : memref<3xf32, #tpu.memory_space<smem>>
    %2 = vector.broadcast %1 : f32 to vector<16x16xf32>
    %3 = arith.addf %0, %2 : vector<16x16xf32>
    %cst_0 = arith.constant 0.000000e+00 : f32
    %4 = vector.broadcast %cst_0 : f32 to vector<16x16xf32>
    %c1 = arith.constant 1 : index
    %5 = memref.load %arg3[%c1] : memref<3xf32, #tpu.memory_space<smem>>
    %6 = vector.broadcast %5 : f32 to vector<16x16xf32>
    %7 = arith.addf %4, %6 : vector<16x16xf32>
    %cst_1 = arith.constant 0.000000e+00 : f32
    %8 = vector.broadcast %cst_1 : f32 to vector<16x16xf32>
    %c2 = arith.constant 2 : index
    %9 = memref.load %arg3[%c2] : memref<3xf32, #tpu.memory_space<smem>>
    %10 = vector.broadcast %9 : f32 to vector<16x16xf32>
    %11 = arith.addf %8, %10 : vector<16x16xf32>
    %c0_2 = arith.constant 0 : index
    %c0_3 = arith.constant 0 : index
    %c0_4 = arith.constant 0 : index
    %c0_5 = arith.constant 0 : index
    %12 = vector.load %arg1[%c0_2, %c0_3, %c0_4, %c0_5] : memref<1x4x18x18xf32, #tpu.memory_space<vmem>>, vector<1x1x18x18xf32>
    %13 = vector.shape_cast %12 : vector<1x1x18x18xf32> to vector<18x18xf32>
    %14 = vector.extract_strided_slice %13 {offsets = [0, 0], sizes = [18, 16], strides = [1, 1]} : vector<18x18xf32> to vector<18x16xf32>
    %15 = vector.extract_strided_slice %13 {offsets = [0, 1], sizes = [18, 16], strides = [1, 1]} : vector<18x18xf32> to vector<18x16xf32>
    %16 = vector.extract_strided_slice %13 {offsets = [0, 2], sizes = [18, 16], strides = [1, 1]} : vector<18x18xf32> to vector<18x16xf32>
    %17 = vector.extract_strided_slice %14 {offsets = [0, 0], sizes = [16, 16], strides = [1, 1]} : vector<18x16xf32> to vector<16x16xf32>
    %c0_6 = arith.constant 0 : index
    %18 = memref.load %arg2[%c0_6] : memref<108xf32, #tpu.memory_space<smem>>
    %19 = vector.broadcast %18 : f32 to vector<16x16xf32>
    %20 = arith.mulf %19, %17 : vector<16x16xf32>
    %21 = arith.addf %3, %20 : vector<16x16xf32>
    %c1_7 = arith.constant 1 : index
    %22 = memref.load %arg2[%c1_7] : memref<108xf32, #tpu.memory_space<smem>>
    %23 = vector.broadcast %22 : f32 to vector<16x16xf32>
    %24 = arith.mulf %23, %17 : vector<16x16xf32>
    %25 = arith.addf %7, %24 : vector<16x16xf32>
    %c2_8 = arith.constant 2 : index
    %26 = memref.load %arg2[%c2_8] : memref<108xf32, #tpu.memory_space<smem>>
    %27 = vector.broadcast %26 : f32 to vector<16x16xf32>
    %28 = arith.mulf %27, %17 : vector<16x16xf32>
    %29 = arith.addf %11, %28 : vector<16x16xf32>
    %30 = vector.extract_strided_slice %15 {offsets = [0, 0], sizes = [16, 16], strides = [1, 1]} : vector<18x16xf32> to vector<16x16xf32>
    %c12 = arith.constant 12 : index
    %31 = memref.load %arg2[%c12] : memref<108xf32, #tpu.memory_space<smem>>
    %32 = vector.broadcast %31 : f32 to vector<16x16xf32>
    %33 = arith.mulf %32, %30 : vector<16x16xf32>
    %34 = arith.addf %21, %33 : vector<16x16xf32>
    %c13 = arith.constant 13 : index
    %35 = memref.load %arg2[%c13] : memref<108xf32, #tpu.memory_space<smem>>
    %36 = vector.broadcast %35 : f32 to vector<16x16xf32>
    %37 = arith.mulf %36, %30 : vector<16x16xf32>
    %38 = arith.addf %25, %37 : vector<16x16xf32>
    %c14 = arith.constant 14 : index
    %39 = memref.load %arg2[%c14] : memref<108xf32, #tpu.memory_space<smem>>
    %40 = vector.broadcast %39 : f32 to vector<16x16xf32>
    %41 = arith.mulf %40, %30 : vector<16x16xf32>
    %42 = arith.addf %29, %41 : vector<16x16xf32>
    %43 = vector.extract_strided_slice %16 {offsets = [0, 0], sizes = [16, 16], strides = [1, 1]} : vector<18x16xf32> to vector<16x16xf32>
    %c24 = arith.constant 24 : index
    %44 = memref.load %arg2[%c24] : memref<108xf32, #tpu.memory_space<smem>>
    %45 = vector.broadcast %44 : f32 to vector<16x16xf32>
    %46 = arith.mulf %45, %43 : vector<16x16xf32>
    %47 = arith.addf %34, %46 : vector<16x16xf32>
    %c25 = arith.constant 25 : index
    %48 = memref.load %arg2[%c25] : memref<108xf32, #tpu.memory_space<smem>>
    %49 = vector.broadcast %48 : f32 to vector<16x16xf32>
    %50 = arith.mulf %49, %43 : vector<16x16xf32>
    %51 = arith.addf %38, %50 : vector<16x16xf32>
    %c26 = arith.constant 26 : index
    %52 = memref.load %arg2[%c26] : memref<108xf32, #tpu.memory_space<smem>>
    %53 = vector.broadcast %52 : f32 to vector<16x16xf32>
    %54 = arith.mulf %53, %43 : vector<16x16xf32>
    %55 = arith.addf %42, %54 : vector<16x16xf32>
    %56 = vector.extract_strided_slice %14 {offsets = [1, 0], sizes = [16, 16], strides = [1, 1]} : vector<18x16xf32> to vector<16x16xf32>
    %c36 = arith.constant 36 : index
    %57 = memref.load %arg2[%c36] : memref<108xf32, #tpu.memory_space<smem>>
    %58 = vector.broadcast %57 : f32 to vector<16x16xf32>
    %59 = arith.mulf %58, %56 : vector<16x16xf32>
    %60 = arith.addf %47, %59 : vector<16x16xf32>
    %c37 = arith.constant 37 : index
    %61 = memref.load %arg2[%c37] : memref<108xf32, #tpu.memory_space<smem>>
    %62 = vector.broadcast %61 : f32 to vector<16x16xf32>
    %63 = arith.mulf %62, %56 : vector<16x16xf32>
    %64 = arith.addf %51, %63 : vector<16x16xf32>
    %c38 = arith.constant 38 : index
    %65 = memref.load %arg2[%c38] : memref<108xf32, #tpu.memory_space<smem>>
    %66 = vector.broadcast %65 : f32 to vector<16x16xf32>
    %67 = arith.mulf %66, %56 : vector<16x16xf32>
    %68 = arith.addf %55, %67 : vector<16x16xf32>
    %69 = vector.extract_strided_slice %15 {offsets = [1, 0], sizes = [16, 16], strides = [1, 1]} : vector<18x16xf32> to vector<16x16xf32>
    %c48 = arith.constant 48 : index
    %70 = memref.load %arg2[%c48] : memref<108xf32, #tpu.memory_space<smem>>
    %71 = vector.broadcast %70 : f32 to vector<16x16xf32>
    %72 = arith.mulf %71, %69 : vector<16x16xf32>
    %73 = arith.addf %60, %72 : vector<16x16xf32>
    %c49 = arith.constant 49 : index
    %74 = memref.load %arg2[%c49] : memref<108xf32, #tpu.memory_space<smem>>
    %75 = vector.broadcast %74 : f32 to vector<16x16xf32>
    %76 = arith.mulf %75, %69 : vector<16x16xf32>
    %77 = arith.addf %64, %76 : vector<16x16xf32>
    %c50 = arith.constant 50 : index
    %78 = memref.load %arg2[%c50] : memref<108xf32, #tpu.memory_space<smem>>
    %79 = vector.broadcast %78 : f32 to vector<16x16xf32>
    %80 = arith.mulf %79, %69 : vector<16x16xf32>
    %81 = arith.addf %68, %80 : vector<16x16xf32>
    %82 = vector.extract_strided_slice %16 {offsets = [1, 0], sizes = [16, 16], strides = [1, 1]} : vector<18x16xf32> to vector<16x16xf32>
    %c60 = arith.constant 60 : index
    %83 = memref.load %arg2[%c60] : memref<108xf32, #tpu.memory_space<smem>>
    %84 = vector.broadcast %83 : f32 to vector<16x16xf32>
    %85 = arith.mulf %84, %82 : vector<16x16xf32>
    %86 = arith.addf %73, %85 : vector<16x16xf32>
    %c61 = arith.constant 61 : index
    %87 = memref.load %arg2[%c61] : memref<108xf32, #tpu.memory_space<smem>>
    %88 = vector.broadcast %87 : f32 to vector<16x16xf32>
    %89 = arith.mulf %88, %82 : vector<16x16xf32>
    %90 = arith.addf %77, %89 : vector<16x16xf32>
    %c62 = arith.constant 62 : index
    %91 = memref.load %arg2[%c62] : memref<108xf32, #tpu.memory_space<smem>>
    %92 = vector.broadcast %91 : f32 to vector<16x16xf32>
    %93 = arith.mulf %92, %82 : vector<16x16xf32>
    %94 = arith.addf %81, %93 : vector<16x16xf32>
    %95 = vector.extract_strided_slice %14 {offsets = [2, 0], sizes = [16, 16], strides = [1, 1]} : vector<18x16xf32> to vector<16x16xf32>
    %c72 = arith.constant 72 : index
    %96 = memref.load %arg2[%c72] : memref<108xf32, #tpu.memory_space<smem>>
    %97 = vector.broadcast %96 : f32 to vector<16x16xf32>
    %98 = arith.mulf %97, %95 : vector<16x16xf32>
    %99 = arith.addf %86, %98 : vector<16x16xf32>
    %c73 = arith.constant 73 : index
    %100 = memref.load %arg2[%c73] : memref<108xf32, #tpu.memory_space<smem>>
    %101 = vector.broadcast %100 : f32 to vector<16x16xf32>
    %102 = arith.mulf %101, %95 : vector<16x16xf32>
    %103 = arith.addf %90, %102 : vector<16x16xf32>
    %c74 = arith.constant 74 : index
    %104 = memref.load %arg2[%c74] : memref<108xf32, #tpu.memory_space<smem>>
    %105 = vector.broadcast %104 : f32 to vector<16x16xf32>
    %106 = arith.mulf %105, %95 : vector<16x16xf32>
    %107 = arith.addf %94, %106 : vector<16x16xf32>
    %108 = vector.extract_strided_slice %15 {offsets = [2, 0], sizes = [16, 16], strides = [1, 1]} : vector<18x16xf32> to vector<16x16xf32>
    %c84 = arith.constant 84 : index
    %109 = memref.load %arg2[%c84] : memref<108xf32, #tpu.memory_space<smem>>
    %110 = vector.broadcast %109 : f32 to vector<16x16xf32>
    %111 = arith.mulf %110, %108 : vector<16x16xf32>
    %112 = arith.addf %99, %111 : vector<16x16xf32>
    %c85 = arith.constant 85 : index
    %113 = memref.load %arg2[%c85] : memref<108xf32, #tpu.memory_space<smem>>
    %114 = vector.broadcast %113 : f32 to vector<16x16xf32>
    %115 = arith.mulf %114, %108 : vector<16x16xf32>
    %116 = arith.addf %103, %115 : vector<16x16xf32>
    %c86 = arith.constant 86 : index
    %117 = memref.load %arg2[%c86] : memref<108xf32, #tpu.memory_space<smem>>
    %118 = vector.broadcast %117 : f32 to vector<16x16xf32>
    %119 = arith.mulf %118, %108 : vector<16x16xf32>
    %120 = arith.addf %107, %119 : vector<16x16xf32>
    %121 = vector.extract_strided_slice %16 {offsets = [2, 0], sizes = [16, 16], strides = [1, 1]} : vector<18x16xf32> to vector<16x16xf32>
    %c96 = arith.constant 96 : index
    %122 = memref.load %arg2[%c96] : memref<108xf32, #tpu.memory_space<smem>>
    %123 = vector.broadcast %122 : f32 to vector<16x16xf32>
    %124 = arith.mulf %123, %121 : vector<16x16xf32>
    %125 = arith.addf %112, %124 : vector<16x16xf32>
    %c97 = arith.constant 97 : index
    %126 = memref.load %arg2[%c97] : memref<108xf32, #tpu.memory_space<smem>>
    %127 = vector.broadcast %126 : f32 to vector<16x16xf32>
    %128 = arith.mulf %127, %121 : vector<16x16xf32>
    %129 = arith.addf %116, %128 : vector<16x16xf32>
    %c98 = arith.constant 98 : index
    %130 = memref.load %arg2[%c98] : memref<108xf32, #tpu.memory_space<smem>>
    %131 = vector.broadcast %130 : f32 to vector<16x16xf32>
    %132 = arith.mulf %131, %121 : vector<16x16xf32>
    %133 = arith.addf %120, %132 : vector<16x16xf32>
    %c0_9 = arith.constant 0 : index
    %c1_10 = arith.constant 1 : index
    %c0_11 = arith.constant 0 : index
    %c0_12 = arith.constant 0 : index
    %134 = vector.load %arg1[%c0_9, %c1_10, %c0_11, %c0_12] : memref<1x4x18x18xf32, #tpu.memory_space<vmem>>, vector<1x1x18x18xf32>
    %135 = vector.shape_cast %134 : vector<1x1x18x18xf32> to vector<18x18xf32>
    %136 = vector.extract_strided_slice %135 {offsets = [0, 0], sizes = [18, 16], strides = [1, 1]} : vector<18x18xf32> to vector<18x16xf32>
    %137 = vector.extract_strided_slice %135 {offsets = [0, 1], sizes = [18, 16], strides = [1, 1]} : vector<18x18xf32> to vector<18x16xf32>
    %138 = vector.extract_strided_slice %135 {offsets = [0, 2], sizes = [18, 16], strides = [1, 1]} : vector<18x18xf32> to vector<18x16xf32>
    %139 = vector.extract_strided_slice %136 {offsets = [0, 0], sizes = [16, 16], strides = [1, 1]} : vector<18x16xf32> to vector<16x16xf32>
    %c3 = arith.constant 3 : index
    %140 = memref.load %arg2[%c3] : memref<108xf32, #tpu.memory_space<smem>>
    %141 = vector.broadcast %140 : f32 to vector<16x16xf32>
    %142 = arith.mulf %141, %139 : vector<16x16xf32>
    %143 = arith.addf %125, %142 : vector<16x16xf32>
    %c4 = arith.constant 4 : index
    %144 = memref.load %arg2[%c4] : memref<108xf32, #tpu.memory_space<smem>>
    %145 = vector.broadcast %144 : f32 to vector<16x16xf32>
    %146 = arith.mulf %145, %139 : vector<16x16xf32>
    %147 = arith.addf %129, %146 : vector<16x16xf32>
    %c5 = arith.constant 5 : index
    %148 = memref.load %arg2[%c5] : memref<108xf32, #tpu.memory_space<smem>>
    %149 = vector.broadcast %148 : f32 to vector<16x16xf32>
    %150 = arith.mulf %149, %139 : vector<16x16xf32>
    %151 = arith.addf %133, %150 : vector<16x16xf32>
    %152 = vector.extract_strided_slice %137 {offsets = [0, 0], sizes = [16, 16], strides = [1, 1]} : vector<18x16xf32> to vector<16x16xf32>
    %c15 = arith.constant 15 : index
    %153 = memref.load %arg2[%c15] : memref<108xf32, #tpu.memory_space<smem>>
    %154 = vector.broadcast %153 : f32 to vector<16x16xf32>
    %155 = arith.mulf %154, %152 : vector<16x16xf32>
    %156 = arith.addf %143, %155 : vector<16x16xf32>
    %c16 = arith.constant 16 : index
    %157 = memref.load %arg2[%c16] : memref<108xf32, #tpu.memory_space<smem>>
    %158 = vector.broadcast %157 : f32 to vector<16x16xf32>
    %159 = arith.mulf %158, %152 : vector<16x16xf32>
    %160 = arith.addf %147, %159 : vector<16x16xf32>
    %c17 = arith.constant 17 : index
    %161 = memref.load %arg2[%c17] : memref<108xf32, #tpu.memory_space<smem>>
    %162 = vector.broadcast %161 : f32 to vector<16x16xf32>
    %163 = arith.mulf %162, %152 : vector<16x16xf32>
    %164 = arith.addf %151, %163 : vector<16x16xf32>
    %165 = vector.extract_strided_slice %138 {offsets = [0, 0], sizes = [16, 16], strides = [1, 1]} : vector<18x16xf32> to vector<16x16xf32>
    %c27 = arith.constant 27 : index
    %166 = memref.load %arg2[%c27] : memref<108xf32, #tpu.memory_space<smem>>
    %167 = vector.broadcast %166 : f32 to vector<16x16xf32>
    %168 = arith.mulf %167, %165 : vector<16x16xf32>
    %169 = arith.addf %156, %168 : vector<16x16xf32>
    %c28 = arith.constant 28 : index
    %170 = memref.load %arg2[%c28] : memref<108xf32, #tpu.memory_space<smem>>
    %171 = vector.broadcast %170 : f32 to vector<16x16xf32>
    %172 = arith.mulf %171, %165 : vector<16x16xf32>
    %173 = arith.addf %160, %172 : vector<16x16xf32>
    %c29 = arith.constant 29 : index
    %174 = memref.load %arg2[%c29] : memref<108xf32, #tpu.memory_space<smem>>
    %175 = vector.broadcast %174 : f32 to vector<16x16xf32>
    %176 = arith.mulf %175, %165 : vector<16x16xf32>
    %177 = arith.addf %164, %176 : vector<16x16xf32>
    %178 = vector.extract_strided_slice %136 {offsets = [1, 0], sizes = [16, 16], strides = [1, 1]} : vector<18x16xf32> to vector<16x16xf32>
    %c39 = arith.constant 39 : index
    %179 = memref.load %arg2[%c39] : memref<108xf32, #tpu.memory_space<smem>>
    %180 = vector.broadcast %179 : f32 to vector<16x16xf32>
    %181 = arith.mulf %180, %178 : vector<16x16xf32>
    %182 = arith.addf %169, %181 : vector<16x16xf32>
    %c40 = arith.constant 40 : index
    %183 = memref.load %arg2[%c40] : memref<108xf32, #tpu.memory_space<smem>>
    %184 = vector.broadcast %183 : f32 to vector<16x16xf32>
    %185 = arith.mulf %184, %178 : vector<16x16xf32>
    %186 = arith.addf %173, %185 : vector<16x16xf32>
    %c41 = arith.constant 41 : index
    %187 = memref.load %arg2[%c41] : memref<108xf32, #tpu.memory_space<smem>>
    %188 = vector.broadcast %187 : f32 to vector<16x16xf32>
    %189 = arith.mulf %188, %178 : vector<16x16xf32>
    %190 = arith.addf %177, %189 : vector<16x16xf32>
    %191 = vector.extract_strided_slice %137 {offsets = [1, 0], sizes = [16, 16], strides = [1, 1]} : vector<18x16xf32> to vector<16x16xf32>
    %c51 = arith.constant 51 : index
    %192 = memref.load %arg2[%c51] : memref<108xf32, #tpu.memory_space<smem>>
    %193 = vector.broadcast %192 : f32 to vector<16x16xf32>
    %194 = arith.mulf %193, %191 : vector<16x16xf32>
    %195 = arith.addf %182, %194 : vector<16x16xf32>
    %c52 = arith.constant 52 : index
    %196 = memref.load %arg2[%c52] : memref<108xf32, #tpu.memory_space<smem>>
    %197 = vector.broadcast %196 : f32 to vector<16x16xf32>
    %198 = arith.mulf %197, %191 : vector<16x16xf32>
    %199 = arith.addf %186, %198 : vector<16x16xf32>
    %c53 = arith.constant 53 : index
    %200 = memref.load %arg2[%c53] : memref<108xf32, #tpu.memory_space<smem>>
    %201 = vector.broadcast %200 : f32 to vector<16x16xf32>
    %202 = arith.mulf %201, %191 : vector<16x16xf32>
    %203 = arith.addf %190, %202 : vector<16x16xf32>
    %204 = vector.extract_strided_slice %138 {offsets = [1, 0], sizes = [16, 16], strides = [1, 1]} : vector<18x16xf32> to vector<16x16xf32>
    %c63 = arith.constant 63 : index
    %205 = memref.load %arg2[%c63] : memref<108xf32, #tpu.memory_space<smem>>
    %206 = vector.broadcast %205 : f32 to vector<16x16xf32>
    %207 = arith.mulf %206, %204 : vector<16x16xf32>
    %208 = arith.addf %195, %207 : vector<16x16xf32>
    %c64 = arith.constant 64 : index
    %209 = memref.load %arg2[%c64] : memref<108xf32, #tpu.memory_space<smem>>
    %210 = vector.broadcast %209 : f32 to vector<16x16xf32>
    %211 = arith.mulf %210, %204 : vector<16x16xf32>
    %212 = arith.addf %199, %211 : vector<16x16xf32>
    %c65 = arith.constant 65 : index
    %213 = memref.load %arg2[%c65] : memref<108xf32, #tpu.memory_space<smem>>
    %214 = vector.broadcast %213 : f32 to vector<16x16xf32>
    %215 = arith.mulf %214, %204 : vector<16x16xf32>
    %216 = arith.addf %203, %215 : vector<16x16xf32>
    %217 = vector.extract_strided_slice %136 {offsets = [2, 0], sizes = [16, 16], strides = [1, 1]} : vector<18x16xf32> to vector<16x16xf32>
    %c75 = arith.constant 75 : index
    %218 = memref.load %arg2[%c75] : memref<108xf32, #tpu.memory_space<smem>>
    %219 = vector.broadcast %218 : f32 to vector<16x16xf32>
    %220 = arith.mulf %219, %217 : vector<16x16xf32>
    %221 = arith.addf %208, %220 : vector<16x16xf32>
    %c76 = arith.constant 76 : index
    %222 = memref.load %arg2[%c76] : memref<108xf32, #tpu.memory_space<smem>>
    %223 = vector.broadcast %222 : f32 to vector<16x16xf32>
    %224 = arith.mulf %223, %217 : vector<16x16xf32>
    %225 = arith.addf %212, %224 : vector<16x16xf32>
    %c77 = arith.constant 77 : index
    %226 = memref.load %arg2[%c77] : memref<108xf32, #tpu.memory_space<smem>>
    %227 = vector.broadcast %226 : f32 to vector<16x16xf32>
    %228 = arith.mulf %227, %217 : vector<16x16xf32>
    %229 = arith.addf %216, %228 : vector<16x16xf32>
    %230 = vector.extract_strided_slice %137 {offsets = [2, 0], sizes = [16, 16], strides = [1, 1]} : vector<18x16xf32> to vector<16x16xf32>
    %c87 = arith.constant 87 : index
    %231 = memref.load %arg2[%c87] : memref<108xf32, #tpu.memory_space<smem>>
    %232 = vector.broadcast %231 : f32 to vector<16x16xf32>
    %233 = arith.mulf %232, %230 : vector<16x16xf32>
    %234 = arith.addf %221, %233 : vector<16x16xf32>
    %c88 = arith.constant 88 : index
    %235 = memref.load %arg2[%c88] : memref<108xf32, #tpu.memory_space<smem>>
    %236 = vector.broadcast %235 : f32 to vector<16x16xf32>
    %237 = arith.mulf %236, %230 : vector<16x16xf32>
    %238 = arith.addf %225, %237 : vector<16x16xf32>
    %c89 = arith.constant 89 : index
    %239 = memref.load %arg2[%c89] : memref<108xf32, #tpu.memory_space<smem>>
    %240 = vector.broadcast %239 : f32 to vector<16x16xf32>
    %241 = arith.mulf %240, %230 : vector<16x16xf32>
    %242 = arith.addf %229, %241 : vector<16x16xf32>
    %243 = vector.extract_strided_slice %138 {offsets = [2, 0], sizes = [16, 16], strides = [1, 1]} : vector<18x16xf32> to vector<16x16xf32>
    %c99 = arith.constant 99 : index
    %244 = memref.load %arg2[%c99] : memref<108xf32, #tpu.memory_space<smem>>
    %245 = vector.broadcast %244 : f32 to vector<16x16xf32>
    %246 = arith.mulf %245, %243 : vector<16x16xf32>
    %247 = arith.addf %234, %246 : vector<16x16xf32>
    %c100 = arith.constant 100 : index
    %248 = memref.load %arg2[%c100] : memref<108xf32, #tpu.memory_space<smem>>
    %249 = vector.broadcast %248 : f32 to vector<16x16xf32>
    %250 = arith.mulf %249, %243 : vector<16x16xf32>
    %251 = arith.addf %238, %250 : vector<16x16xf32>
    %c101 = arith.constant 101 : index
    %252 = memref.load %arg2[%c101] : memref<108xf32, #tpu.memory_space<smem>>
    %253 = vector.broadcast %252 : f32 to vector<16x16xf32>
    %254 = arith.mulf %253, %243 : vector<16x16xf32>
    %255 = arith.addf %242, %254 : vector<16x16xf32>
    %c0_13 = arith.constant 0 : index
    %c2_14 = arith.constant 2 : index
    %c0_15 = arith.constant 0 : index
    %c0_16 = arith.constant 0 : index
    %256 = vector.load %arg1[%c0_13, %c2_14, %c0_15, %c0_16] : memref<1x4x18x18xf32, #tpu.memory_space<vmem>>, vector<1x1x18x18xf32>
    %257 = vector.shape_cast %256 : vector<1x1x18x18xf32> to vector<18x18xf32>
    %258 = vector.extract_strided_slice %257 {offsets = [0, 0], sizes = [18, 16], strides = [1, 1]} : vector<18x18xf32> to vector<18x16xf32>
    %259 = vector.extract_strided_slice %257 {offsets = [0, 1], sizes = [18, 16], strides = [1, 1]} : vector<18x18xf32> to vector<18x16xf32>
    %260 = vector.extract_strided_slice %257 {offsets = [0, 2], sizes = [18, 16], strides = [1, 1]} : vector<18x18xf32> to vector<18x16xf32>
    %261 = vector.extract_strided_slice %258 {offsets = [0, 0], sizes = [16, 16], strides = [1, 1]} : vector<18x16xf32> to vector<16x16xf32>
    %c6 = arith.constant 6 : index
    %262 = memref.load %arg2[%c6] : memref<108xf32, #tpu.memory_space<smem>>
    %263 = vector.broadcast %262 : f32 to vector<16x16xf32>
    %264 = arith.mulf %263, %261 : vector<16x16xf32>
    %265 = arith.addf %247, %264 : vector<16x16xf32>
    %c7 = arith.constant 7 : index
    %266 = memref.load %arg2[%c7] : memref<108xf32, #tpu.memory_space<smem>>
    %267 = vector.broadcast %266 : f32 to vector<16x16xf32>
    %268 = arith.mulf %267, %261 : vector<16x16xf32>
    %269 = arith.addf %251, %268 : vector<16x16xf32>
    %c8 = arith.constant 8 : index
    %270 = memref.load %arg2[%c8] : memref<108xf32, #tpu.memory_space<smem>>
    %271 = vector.broadcast %270 : f32 to vector<16x16xf32>
    %272 = arith.mulf %271, %261 : vector<16x16xf32>
    %273 = arith.addf %255, %272 : vector<16x16xf32>
    %274 = vector.extract_strided_slice %259 {offsets = [0, 0], sizes = [16, 16], strides = [1, 1]} : vector<18x16xf32> to vector<16x16xf32>
    %c18 = arith.constant 18 : index
    %275 = memref.load %arg2[%c18] : memref<108xf32, #tpu.memory_space<smem>>
    %276 = vector.broadcast %275 : f32 to vector<16x16xf32>
    %277 = arith.mulf %276, %274 : vector<16x16xf32>
    %278 = arith.addf %265, %277 : vector<16x16xf32>
    %c19 = arith.constant 19 : index
    %279 = memref.load %arg2[%c19] : memref<108xf32, #tpu.memory_space<smem>>
    %280 = vector.broadcast %279 : f32 to vector<16x16xf32>
    %281 = arith.mulf %280, %274 : vector<16x16xf32>
    %282 = arith.addf %269, %281 : vector<16x16xf32>
    %c20 = arith.constant 20 : index
    %283 = memref.load %arg2[%c20] : memref<108xf32, #tpu.memory_space<smem>>
    %284 = vector.broadcast %283 : f32 to vector<16x16xf32>
    %285 = arith.mulf %284, %274 : vector<16x16xf32>
    %286 = arith.addf %273, %285 : vector<16x16xf32>
    %287 = vector.extract_strided_slice %260 {offsets = [0, 0], sizes = [16, 16], strides = [1, 1]} : vector<18x16xf32> to vector<16x16xf32>
    %c30 = arith.constant 30 : index
    %288 = memref.load %arg2[%c30] : memref<108xf32, #tpu.memory_space<smem>>
    %289 = vector.broadcast %288 : f32 to vector<16x16xf32>
    %290 = arith.mulf %289, %287 : vector<16x16xf32>
    %291 = arith.addf %278, %290 : vector<16x16xf32>
    %c31 = arith.constant 31 : index
    %292 = memref.load %arg2[%c31] : memref<108xf32, #tpu.memory_space<smem>>
    %293 = vector.broadcast %292 : f32 to vector<16x16xf32>
    %294 = arith.mulf %293, %287 : vector<16x16xf32>
    %295 = arith.addf %282, %294 : vector<16x16xf32>
    %c32 = arith.constant 32 : index
    %296 = memref.load %arg2[%c32] : memref<108xf32, #tpu.memory_space<smem>>
    %297 = vector.broadcast %296 : f32 to vector<16x16xf32>
    %298 = arith.mulf %297, %287 : vector<16x16xf32>
    %299 = arith.addf %286, %298 : vector<16x16xf32>
    %300 = vector.extract_strided_slice %258 {offsets = [1, 0], sizes = [16, 16], strides = [1, 1]} : vector<18x16xf32> to vector<16x16xf32>
    %c42 = arith.constant 42 : index
    %301 = memref.load %arg2[%c42] : memref<108xf32, #tpu.memory_space<smem>>
    %302 = vector.broadcast %301 : f32 to vector<16x16xf32>
    %303 = arith.mulf %302, %300 : vector<16x16xf32>
    %304 = arith.addf %291, %303 : vector<16x16xf32>
    %c43 = arith.constant 43 : index
    %305 = memref.load %arg2[%c43] : memref<108xf32, #tpu.memory_space<smem>>
    %306 = vector.broadcast %305 : f32 to vector<16x16xf32>
    %307 = arith.mulf %306, %300 : vector<16x16xf32>
    %308 = arith.addf %295, %307 : vector<16x16xf32>
    %c44 = arith.constant 44 : index
    %309 = memref.load %arg2[%c44] : memref<108xf32, #tpu.memory_space<smem>>
    %310 = vector.broadcast %309 : f32 to vector<16x16xf32>
    %311 = arith.mulf %310, %300 : vector<16x16xf32>
    %312 = arith.addf %299, %311 : vector<16x16xf32>
    %313 = vector.extract_strided_slice %259 {offsets = [1, 0], sizes = [16, 16], strides = [1, 1]} : vector<18x16xf32> to vector<16x16xf32>
    %c54 = arith.constant 54 : index
    %314 = memref.load %arg2[%c54] : memref<108xf32, #tpu.memory_space<smem>>
    %315 = vector.broadcast %314 : f32 to vector<16x16xf32>
    %316 = arith.mulf %315, %313 : vector<16x16xf32>
    %317 = arith.addf %304, %316 : vector<16x16xf32>
    %c55 = arith.constant 55 : index
    %318 = memref.load %arg2[%c55] : memref<108xf32, #tpu.memory_space<smem>>
    %319 = vector.broadcast %318 : f32 to vector<16x16xf32>
    %320 = arith.mulf %319, %313 : vector<16x16xf32>
    %321 = arith.addf %308, %320 : vector<16x16xf32>
    %c56 = arith.constant 56 : index
    %322 = memref.load %arg2[%c56] : memref<108xf32, #tpu.memory_space<smem>>
    %323 = vector.broadcast %322 : f32 to vector<16x16xf32>
    %324 = arith.mulf %323, %313 : vector<16x16xf32>
    %325 = arith.addf %312, %324 : vector<16x16xf32>
    %326 = vector.extract_strided_slice %260 {offsets = [1, 0], sizes = [16, 16], strides = [1, 1]} : vector<18x16xf32> to vector<16x16xf32>
    %c66 = arith.constant 66 : index
    %327 = memref.load %arg2[%c66] : memref<108xf32, #tpu.memory_space<smem>>
    %328 = vector.broadcast %327 : f32 to vector<16x16xf32>
    %329 = arith.mulf %328, %326 : vector<16x16xf32>
    %330 = arith.addf %317, %329 : vector<16x16xf32>
    %c67 = arith.constant 67 : index
    %331 = memref.load %arg2[%c67] : memref<108xf32, #tpu.memory_space<smem>>
    %332 = vector.broadcast %331 : f32 to vector<16x16xf32>
    %333 = arith.mulf %332, %326 : vector<16x16xf32>
    %334 = arith.addf %321, %333 : vector<16x16xf32>
    %c68 = arith.constant 68 : index
    %335 = memref.load %arg2[%c68] : memref<108xf32, #tpu.memory_space<smem>>
    %336 = vector.broadcast %335 : f32 to vector<16x16xf32>
    %337 = arith.mulf %336, %326 : vector<16x16xf32>
    %338 = arith.addf %325, %337 : vector<16x16xf32>
    %339 = vector.extract_strided_slice %258 {offsets = [2, 0], sizes = [16, 16], strides = [1, 1]} : vector<18x16xf32> to vector<16x16xf32>
    %c78 = arith.constant 78 : index
    %340 = memref.load %arg2[%c78] : memref<108xf32, #tpu.memory_space<smem>>
    %341 = vector.broadcast %340 : f32 to vector<16x16xf32>
    %342 = arith.mulf %341, %339 : vector<16x16xf32>
    %343 = arith.addf %330, %342 : vector<16x16xf32>
    %c79 = arith.constant 79 : index
    %344 = memref.load %arg2[%c79] : memref<108xf32, #tpu.memory_space<smem>>
    %345 = vector.broadcast %344 : f32 to vector<16x16xf32>
    %346 = arith.mulf %345, %339 : vector<16x16xf32>
    %347 = arith.addf %334, %346 : vector<16x16xf32>
    %c80 = arith.constant 80 : index
    %348 = memref.load %arg2[%c80] : memref<108xf32, #tpu.memory_space<smem>>
    %349 = vector.broadcast %348 : f32 to vector<16x16xf32>
    %350 = arith.mulf %349, %339 : vector<16x16xf32>
    %351 = arith.addf %338, %350 : vector<16x16xf32>
    %352 = vector.extract_strided_slice %259 {offsets = [2, 0], sizes = [16, 16], strides = [1, 1]} : vector<18x16xf32> to vector<16x16xf32>
    %c90 = arith.constant 90 : index
    %353 = memref.load %arg2[%c90] : memref<108xf32, #tpu.memory_space<smem>>
    %354 = vector.broadcast %353 : f32 to vector<16x16xf32>
    %355 = arith.mulf %354, %352 : vector<16x16xf32>
    %356 = arith.addf %343, %355 : vector<16x16xf32>
    %c91 = arith.constant 91 : index
    %357 = memref.load %arg2[%c91] : memref<108xf32, #tpu.memory_space<smem>>
    %358 = vector.broadcast %357 : f32 to vector<16x16xf32>
    %359 = arith.mulf %358, %352 : vector<16x16xf32>
    %360 = arith.addf %347, %359 : vector<16x16xf32>
    %c92 = arith.constant 92 : index
    %361 = memref.load %arg2[%c92] : memref<108xf32, #tpu.memory_space<smem>>
    %362 = vector.broadcast %361 : f32 to vector<16x16xf32>
    %363 = arith.mulf %362, %352 : vector<16x16xf32>
    %364 = arith.addf %351, %363 : vector<16x16xf32>
    %365 = vector.extract_strided_slice %260 {offsets = [2, 0], sizes = [16, 16], strides = [1, 1]} : vector<18x16xf32> to vector<16x16xf32>
    %c102 = arith.constant 102 : index
    %366 = memref.load %arg2[%c102] : memref<108xf32, #tpu.memory_space<smem>>
    %367 = vector.broadcast %366 : f32 to vector<16x16xf32>
    %368 = arith.mulf %367, %365 : vector<16x16xf32>
    %369 = arith.addf %356, %368 : vector<16x16xf32>
    %c103 = arith.constant 103 : index
    %370 = memref.load %arg2[%c103] : memref<108xf32, #tpu.memory_space<smem>>
    %371 = vector.broadcast %370 : f32 to vector<16x16xf32>
    %372 = arith.mulf %371, %365 : vector<16x16xf32>
    %373 = arith.addf %360, %372 : vector<16x16xf32>
    %c104 = arith.constant 104 : index
    %374 = memref.load %arg2[%c104] : memref<108xf32, #tpu.memory_space<smem>>
    %375 = vector.broadcast %374 : f32 to vector<16x16xf32>
    %376 = arith.mulf %375, %365 : vector<16x16xf32>
    %377 = arith.addf %364, %376 : vector<16x16xf32>
    %c0_17 = arith.constant 0 : index
    %c3_18 = arith.constant 3 : index
    %c0_19 = arith.constant 0 : index
    %c0_20 = arith.constant 0 : index
    %378 = vector.load %arg1[%c0_17, %c3_18, %c0_19, %c0_20] : memref<1x4x18x18xf32, #tpu.memory_space<vmem>>, vector<1x1x18x18xf32>
    %379 = vector.shape_cast %378 : vector<1x1x18x18xf32> to vector<18x18xf32>
    %380 = vector.extract_strided_slice %379 {offsets = [0, 0], sizes = [18, 16], strides = [1, 1]} : vector<18x18xf32> to vector<18x16xf32>
    %381 = vector.extract_strided_slice %379 {offsets = [0, 1], sizes = [18, 16], strides = [1, 1]} : vector<18x18xf32> to vector<18x16xf32>
    %382 = vector.extract_strided_slice %379 {offsets = [0, 2], sizes = [18, 16], strides = [1, 1]} : vector<18x18xf32> to vector<18x16xf32>
    %383 = vector.extract_strided_slice %380 {offsets = [0, 0], sizes = [16, 16], strides = [1, 1]} : vector<18x16xf32> to vector<16x16xf32>
    %c9 = arith.constant 9 : index
    %384 = memref.load %arg2[%c9] : memref<108xf32, #tpu.memory_space<smem>>
    %385 = vector.broadcast %384 : f32 to vector<16x16xf32>
    %386 = arith.mulf %385, %383 : vector<16x16xf32>
    %387 = arith.addf %369, %386 : vector<16x16xf32>
    %c10 = arith.constant 10 : index
    %388 = memref.load %arg2[%c10] : memref<108xf32, #tpu.memory_space<smem>>
    %389 = vector.broadcast %388 : f32 to vector<16x16xf32>
    %390 = arith.mulf %389, %383 : vector<16x16xf32>
    %391 = arith.addf %373, %390 : vector<16x16xf32>
    %c11 = arith.constant 11 : index
    %392 = memref.load %arg2[%c11] : memref<108xf32, #tpu.memory_space<smem>>
    %393 = vector.broadcast %392 : f32 to vector<16x16xf32>
    %394 = arith.mulf %393, %383 : vector<16x16xf32>
    %395 = arith.addf %377, %394 : vector<16x16xf32>
    %396 = vector.extract_strided_slice %381 {offsets = [0, 0], sizes = [16, 16], strides = [1, 1]} : vector<18x16xf32> to vector<16x16xf32>
    %c21 = arith.constant 21 : index
    %397 = memref.load %arg2[%c21] : memref<108xf32, #tpu.memory_space<smem>>
    %398 = vector.broadcast %397 : f32 to vector<16x16xf32>
    %399 = arith.mulf %398, %396 : vector<16x16xf32>
    %400 = arith.addf %387, %399 : vector<16x16xf32>
    %c22 = arith.constant 22 : index
    %401 = memref.load %arg2[%c22] : memref<108xf32, #tpu.memory_space<smem>>
    %402 = vector.broadcast %401 : f32 to vector<16x16xf32>
    %403 = arith.mulf %402, %396 : vector<16x16xf32>
    %404 = arith.addf %391, %403 : vector<16x16xf32>
    %c23 = arith.constant 23 : index
    %405 = memref.load %arg2[%c23] : memref<108xf32, #tpu.memory_space<smem>>
    %406 = vector.broadcast %405 : f32 to vector<16x16xf32>
    %407 = arith.mulf %406, %396 : vector<16x16xf32>
    %408 = arith.addf %395, %407 : vector<16x16xf32>
    %409 = vector.extract_strided_slice %382 {offsets = [0, 0], sizes = [16, 16], strides = [1, 1]} : vector<18x16xf32> to vector<16x16xf32>
    %c33 = arith.constant 33 : index
    %410 = memref.load %arg2[%c33] : memref<108xf32, #tpu.memory_space<smem>>
    %411 = vector.broadcast %410 : f32 to vector<16x16xf32>
    %412 = arith.mulf %411, %409 : vector<16x16xf32>
    %413 = arith.addf %400, %412 : vector<16x16xf32>
    %c34 = arith.constant 34 : index
    %414 = memref.load %arg2[%c34] : memref<108xf32, #tpu.memory_space<smem>>
    %415 = vector.broadcast %414 : f32 to vector<16x16xf32>
    %416 = arith.mulf %415, %409 : vector<16x16xf32>
    %417 = arith.addf %404, %416 : vector<16x16xf32>
    %c35 = arith.constant 35 : index
    %418 = memref.load %arg2[%c35] : memref<108xf32, #tpu.memory_space<smem>>
    %419 = vector.broadcast %418 : f32 to vector<16x16xf32>
    %420 = arith.mulf %419, %409 : vector<16x16xf32>
    %421 = arith.addf %408, %420 : vector<16x16xf32>
    %422 = vector.extract_strided_slice %380 {offsets = [1, 0], sizes = [16, 16], strides = [1, 1]} : vector<18x16xf32> to vector<16x16xf32>
    %c45 = arith.constant 45 : index
    %423 = memref.load %arg2[%c45] : memref<108xf32, #tpu.memory_space<smem>>
    %424 = vector.broadcast %423 : f32 to vector<16x16xf32>
    %425 = arith.mulf %424, %422 : vector<16x16xf32>
    %426 = arith.addf %413, %425 : vector<16x16xf32>
    %c46 = arith.constant 46 : index
    %427 = memref.load %arg2[%c46] : memref<108xf32, #tpu.memory_space<smem>>
    %428 = vector.broadcast %427 : f32 to vector<16x16xf32>
    %429 = arith.mulf %428, %422 : vector<16x16xf32>
    %430 = arith.addf %417, %429 : vector<16x16xf32>
    %c47 = arith.constant 47 : index
    %431 = memref.load %arg2[%c47] : memref<108xf32, #tpu.memory_space<smem>>
    %432 = vector.broadcast %431 : f32 to vector<16x16xf32>
    %433 = arith.mulf %432, %422 : vector<16x16xf32>
    %434 = arith.addf %421, %433 : vector<16x16xf32>
    %435 = vector.extract_strided_slice %381 {offsets = [1, 0], sizes = [16, 16], strides = [1, 1]} : vector<18x16xf32> to vector<16x16xf32>
    %c57 = arith.constant 57 : index
    %436 = memref.load %arg2[%c57] : memref<108xf32, #tpu.memory_space<smem>>
    %437 = vector.broadcast %436 : f32 to vector<16x16xf32>
    %438 = arith.mulf %437, %435 : vector<16x16xf32>
    %439 = arith.addf %426, %438 : vector<16x16xf32>
    %c58 = arith.constant 58 : index
    %440 = memref.load %arg2[%c58] : memref<108xf32, #tpu.memory_space<smem>>
    %441 = vector.broadcast %440 : f32 to vector<16x16xf32>
    %442 = arith.mulf %441, %435 : vector<16x16xf32>
    %443 = arith.addf %430, %442 : vector<16x16xf32>
    %c59 = arith.constant 59 : index
    %444 = memref.load %arg2[%c59] : memref<108xf32, #tpu.memory_space<smem>>
    %445 = vector.broadcast %444 : f32 to vector<16x16xf32>
    %446 = arith.mulf %445, %435 : vector<16x16xf32>
    %447 = arith.addf %434, %446 : vector<16x16xf32>
    %448 = vector.extract_strided_slice %382 {offsets = [1, 0], sizes = [16, 16], strides = [1, 1]} : vector<18x16xf32> to vector<16x16xf32>
    %c69 = arith.constant 69 : index
    %449 = memref.load %arg2[%c69] : memref<108xf32, #tpu.memory_space<smem>>
    %450 = vector.broadcast %449 : f32 to vector<16x16xf32>
    %451 = arith.mulf %450, %448 : vector<16x16xf32>
    %452 = arith.addf %439, %451 : vector<16x16xf32>
    %c70 = arith.constant 70 : index
    %453 = memref.load %arg2[%c70] : memref<108xf32, #tpu.memory_space<smem>>
    %454 = vector.broadcast %453 : f32 to vector<16x16xf32>
    %455 = arith.mulf %454, %448 : vector<16x16xf32>
    %456 = arith.addf %443, %455 : vector<16x16xf32>
    %c71 = arith.constant 71 : index
    %457 = memref.load %arg2[%c71] : memref<108xf32, #tpu.memory_space<smem>>
    %458 = vector.broadcast %457 : f32 to vector<16x16xf32>
    %459 = arith.mulf %458, %448 : vector<16x16xf32>
    %460 = arith.addf %447, %459 : vector<16x16xf32>
    %461 = vector.extract_strided_slice %380 {offsets = [2, 0], sizes = [16, 16], strides = [1, 1]} : vector<18x16xf32> to vector<16x16xf32>
    %c81 = arith.constant 81 : index
    %462 = memref.load %arg2[%c81] : memref<108xf32, #tpu.memory_space<smem>>
    %463 = vector.broadcast %462 : f32 to vector<16x16xf32>
    %464 = arith.mulf %463, %461 : vector<16x16xf32>
    %465 = arith.addf %452, %464 : vector<16x16xf32>
    %c82 = arith.constant 82 : index
    %466 = memref.load %arg2[%c82] : memref<108xf32, #tpu.memory_space<smem>>
    %467 = vector.broadcast %466 : f32 to vector<16x16xf32>
    %468 = arith.mulf %467, %461 : vector<16x16xf32>
    %469 = arith.addf %456, %468 : vector<16x16xf32>
    %c83 = arith.constant 83 : index
    %470 = memref.load %arg2[%c83] : memref<108xf32, #tpu.memory_space<smem>>
    %471 = vector.broadcast %470 : f32 to vector<16x16xf32>
    %472 = arith.mulf %471, %461 : vector<16x16xf32>
    %473 = arith.addf %460, %472 : vector<16x16xf32>
    %474 = vector.extract_strided_slice %381 {offsets = [2, 0], sizes = [16, 16], strides = [1, 1]} : vector<18x16xf32> to vector<16x16xf32>
    %c93 = arith.constant 93 : index
    %475 = memref.load %arg2[%c93] : memref<108xf32, #tpu.memory_space<smem>>
    %476 = vector.broadcast %475 : f32 to vector<16x16xf32>
    %477 = arith.mulf %476, %474 : vector<16x16xf32>
    %478 = arith.addf %465, %477 : vector<16x16xf32>
    %c94 = arith.constant 94 : index
    %479 = memref.load %arg2[%c94] : memref<108xf32, #tpu.memory_space<smem>>
    %480 = vector.broadcast %479 : f32 to vector<16x16xf32>
    %481 = arith.mulf %480, %474 : vector<16x16xf32>
    %482 = arith.addf %469, %481 : vector<16x16xf32>
    %c95 = arith.constant 95 : index
    %483 = memref.load %arg2[%c95] : memref<108xf32, #tpu.memory_space<smem>>
    %484 = vector.broadcast %483 : f32 to vector<16x16xf32>
    %485 = arith.mulf %484, %474 : vector<16x16xf32>
    %486 = arith.addf %473, %485 : vector<16x16xf32>
    %487 = vector.extract_strided_slice %382 {offsets = [2, 0], sizes = [16, 16], strides = [1, 1]} : vector<18x16xf32> to vector<16x16xf32>
    %c105 = arith.constant 105 : index
    %488 = memref.load %arg2[%c105] : memref<108xf32, #tpu.memory_space<smem>>
    %489 = vector.broadcast %488 : f32 to vector<16x16xf32>
    %490 = arith.mulf %489, %487 : vector<16x16xf32>
    %491 = arith.addf %478, %490 : vector<16x16xf32>
    %c106 = arith.constant 106 : index
    %492 = memref.load %arg2[%c106] : memref<108xf32, #tpu.memory_space<smem>>
    %493 = vector.broadcast %492 : f32 to vector<16x16xf32>
    %494 = arith.mulf %493, %487 : vector<16x16xf32>
    %495 = arith.addf %482, %494 : vector<16x16xf32>
    %c107 = arith.constant 107 : index
    %496 = memref.load %arg2[%c107] : memref<108xf32, #tpu.memory_space<smem>>
    %497 = vector.broadcast %496 : f32 to vector<16x16xf32>
    %498 = arith.mulf %497, %487 : vector<16x16xf32>
    %499 = arith.addf %486, %498 : vector<16x16xf32>
    %cst_21 = arith.constant -1.000000e+00 : f32
    %cst_22 = arith.constant 1.000000e+00 : f32
    %500 = vector.broadcast %cst_21 : f32 to vector<16x16xf32>
    %501 = arith.maximumf %500, %491 : vector<16x16xf32>
    %502 = vector.broadcast %cst_22 : f32 to vector<16x16xf32>
    %503 = arith.minimumf %502, %501 : vector<16x16xf32>
    %c0_23 = arith.constant 0 : index
    %c0_24 = arith.constant 0 : index
    %c0_25 = arith.constant 0 : index
    %c0_26 = arith.constant 0 : index
    %504 = vector.load %arg4[%c0_23, %c0_24, %c0_25, %c0_26] : memref<1x3x16x16xf32, #tpu.memory_space<vmem>>, vector<1x1x16x16xf32>
    %505 = vector.shape_cast %504 : vector<1x1x16x16xf32> to vector<16x16xf32>
    %506 = vector.shape_cast %503 : vector<16x16xf32> to vector<1x1x16x16xf32>
    tpu.vector_store %arg4[%c0_23, %c0_24, %c0_25, %c0_26], %506 {strides = array<i32>} : memref<1x3x16x16xf32, #tpu.memory_space<vmem>>, vector<1x1x16x16xf32>,
    %cst_27 = arith.constant -1.000000e+00 : f32
    %cst_28 = arith.constant 1.000000e+00 : f32
    %507 = vector.broadcast %cst_27 : f32 to vector<16x16xf32>
    %508 = arith.maximumf %507, %495 : vector<16x16xf32>
    %509 = vector.broadcast %cst_28 : f32 to vector<16x16xf32>
    %510 = arith.minimumf %509, %508 : vector<16x16xf32>
    %c0_29 = arith.constant 0 : index
    %c1_30 = arith.constant 1 : index
    %c0_31 = arith.constant 0 : index
    %c0_32 = arith.constant 0 : index
    %511 = vector.load %arg4[%c0_29, %c1_30, %c0_31, %c0_32] : memref<1x3x16x16xf32, #tpu.memory_space<vmem>>, vector<1x1x16x16xf32>
    %512 = vector.shape_cast %511 : vector<1x1x16x16xf32> to vector<16x16xf32>
    %513 = vector.shape_cast %510 : vector<16x16xf32> to vector<1x1x16x16xf32>
    tpu.vector_store %arg4[%c0_29, %c1_30, %c0_31, %c0_32], %513 {strides = array<i32>} : memref<1x3x16x16xf32, #tpu.memory_space<vmem>>, vector<1x1x16x16xf32>,
    %cst_33 = arith.constant -1.000000e+00 : f32
    %cst_34 = arith.constant 1.000000e+00 : f32
    %514 = vector.broadcast %cst_33 : f32 to vector<16x16xf32>
    %515 = arith.maximumf %514, %499 : vector<16x16xf32>
    %516 = vector.broadcast %cst_34 : f32 to vector<16x16xf32>
    %517 = arith.minimumf %516, %515 : vector<16x16xf32>
    %c0_35 = arith.constant 0 : index
    %c2_36 = arith.constant 2 : index
    %c0_37 = arith.constant 0 : index
    %c0_38 = arith.constant 0 : index
    %518 = vector.load %arg4[%c0_35, %c2_36, %c0_37, %c0_38] : memref<1x3x16x16xf32, #tpu.memory_space<vmem>>, vector<1x1x16x16xf32>
    %519 = vector.shape_cast %518 : vector<1x1x16x16xf32> to vector<16x16xf32>
    %520 = vector.shape_cast %517 : vector<16x16xf32> to vector<1x1x16x16xf32>
    tpu.vector_store %arg4[%c0_35, %c2_36, %c0_37, %c0_38], %520 {strides = array<i32>} : memref<1x3x16x16xf32, #tpu.memory_space<vmem>>, vector<1x1x16x16xf32>,
    return
  }
  func.func @transform_0(%arg0: i32) -> (i32, i32, i32, i32) {
    %c0_i32 = arith.constant 0 : i32
    %c0_i32_0 = arith.constant 0 : i32
    %c0_i32_1 = arith.constant 0 : i32
    %c0_i32_2 = arith.constant 0 : i32
    return %arg0, %c0_i32, %c0_i32_0, %c0_i32_1 : i32, i32, i32, i32
  }
  func.func @transform_1(%arg0: i32) -> i32 {
    %c0_i32 = arith.constant 0 : i32
    %c0_i32_0 = arith.constant 0 : i32
    return %c0_i32 : i32
  }
  func.func @transform_2(%arg0: i32) -> i32 {
    %c0_i32 = arith.constant 0 : i32
    %c0_i32_0 = arith.constant 0 : i32
    return %c0_i32 : i32
  }
  func.func @transform_3(%arg0: i32) -> (i32, i32, i32, i32) {
    %c0_i32 = arith.constant 0 : i32
    %c0_i32_0 = arith.constant 0 : i32
    %c0_i32_1 = arith.constant 0 : i32
    %c0_i32_2 = arith.constant 0 : i32
    return %arg0, %c0_i32, %c0_i32_0, %c0_i32_1 : i32, i32, i32, i32
  }
}

</mosaic_0001>

<bundles_post_ra>
// kernel: tpu_custom_call.1
= control target key start
LH: loop header
LB: loop body
LE: loop exit
PB: predicated region body
PF: predicated region fallthrough
CT: control target
= control target key end

     0   :  { %8 = vsyncpa [#allocation4], 0  ;;  %s3844_s0 = inlined_call_operand.vmem [shape: f32[2,4,18,18], index: 0, kind: input, shape index: {}]   ;;  %s3845_s1 = inlined_call_operand.vmem [shape: f32[108], index: 1, kind: input, shape index: {}]   ;;  %s3846_s2 = inlined_call_operand.vmem [shape: f32[3], index: 2, kind: input, shape index: {}]   ;;  %s3847_s3 = inlined_call_operand.hbm [shape: f32[2,3,16,16], index: 3, kind: output, shape index: {}]  }
   0x1   :  { %9 = vsyncpa [#allocation6], 0 }
   0x2   :  { %10 = vsyncpa [#allocation3], 0 }
   0x3   :  { %12 = vsyncpa [#allocation3 + $0x1], 0  ;;  %s2511_s12 = smov 0   ;;  %s2513_s13 = smov 0  }
   0x4   :  { %s2515_s14 = smov 0   ;;  %s2517_s15 = smov 0  }
   0x5 LB: > { %s2532_s16 = sadd.s32 4294967295, %s2482_s15   ;;  %s2165_s17 = sadd.s32 4294967294, %s2482_s15   ;;  %s2482_s15 = sphi %s2517_s15, %s3925_s15   ;;  %s2478_s14 = sphi %s2515_s14, %s3924_s14   ;;  %s2474_s13 = sphi %s2513_s13, %s3923_s13   ;;  %s2470_s12 = sphi %s2511_s12, %s3922_s12  }
   0x6   : > { %s2536_s18 = sadd.s32 1, %s2482_s15   ;;  %s93_s19 = sadd.s32 1, %s2478_s14 }
   0x7   : > { %s90_s20 = ssub.s32 %s2482_s15, %s2536_s18  ;;  %p103_p0 = scmp.ne.s32.totalorder %s2478_s14, %s2474_s13 }
   0x8   : > { %p91_p1 = scmp.eq.s32.totalorder %s90_s20, 0  ;;  %p104_p2 = scmp.eq.s32.totalorder %s2532_s16, 1 }
   0x9   : > { %p109_p3 = scmp.ne.s32.totalorder %s2474_s13, %s2470_s12  ;;  %p110_p4 = scmp.eq.s32.totalorder %s2165_s17, 1 }
   0xa   : > { %s2547_s21 = scalar_select %p91_p1, %s2478_s14, %s93_s19  }
   0xb   : > { %p2549_p5 = por %p104_p2, %p103_p0  ;;  %p2553_p6 = por %p110_p4, %p109_p3 }
   0xc   : > { %p2166_p7 = scmp.ge.s32.totalorder %s2482_s15, 1  ;;  %p117_p8 = scmp.lt.s32.totalorder %s2482_s15, 3 }
   0xd   : > { %s3851_s22 = scalar_select %p2549_p5, 1, 0 }
   0xe   : > { %s3852_s23 = scalar_select %p2553_p6, 1, 0 }
   0xf   : > { %p3848_p9 = scmp.eq.s32.totalorder %s2532_s16, 0  ;;  %p2560_p10 = pnand %p2166_p7, %p117_p8 }
  0x10   : > { %s130_s27 = sshll.u32 %s3845_s1, 4  ;;  %s141_s30 = sshll.u32 %s3846_s2, 4  ;;  %s131_s27 = int_to_ptr.vmem [resolvable:$true] %s130_s27  ;;  %s142_s30 = int_to_ptr.vmem [resolvable:$true] %s141_s30 }
  0x11   : > { %s3853_s24 = scalar_select %p2560_p10, 1, 0 }
  0x12   : > { %p2318_p11 = pneg %p2560_p10  ;;  %s2382_s5 = scalar_lea.vmem %s131_s27, 16 }
  0x13   : > { %p2383_p13 = scmp.ne.s32.totalorder %s131_s27, %s2382_s5  ;;  %p2390_p3 = scmp.lt.s32.totalorder %s131_s27, %s131_s27 }
  0x14   : > { %p2574_p12 = pnand %p3848_p9, %p2318_p11  ;;  %p2391_p4 = scmp.lt.s32.totalorder %s2382_s5, %s2382_s5 }
  0x16   : > { %p2384_p0 = pneg %p2574_p12  ;;  %p2392_p7 = por %p2391_p4, %p2390_p3 }
  0x18   : > { %p2385_p1 = pnand %p2384_p0, %p2383_p13 }
  0x1a   : > { %p2386_p2 = pneg %p2385_p1 }
  0x1c   : > { %p2393_p8 = pnand %p2392_p7, %p2386_p2 }
  0x1e   : > { %2396 = shalt.err (!%p2393_p8)
}
  0x1f   : > { %s2484_s6 = smov [#allocation2]   ;;  %s2397_s7 = scalar_lea.vmem %s142_s30, 16 }
  0x20   : > { %2321 = dma.vmem_to_smem (!%p2574_p12), %s131_s27, 16, %s2484_s6, [#allocation4]  }
  0x21   : > { %p2398_p11 = scmp.ne.s32.totalorder %s142_s30, %s2397_s7  ;;  %p2405_p5 = scmp.lt.s32.totalorder %s142_s30, %s142_s30 }
  0x22   : > { %p2406_p10 = scmp.lt.s32.totalorder %s2397_s7, %s2397_s7 }
  0x23   : > { %p2400_p9 = pnand %p2398_p11, %p2384_p0 }
  0x24   : > { %p2407_p13 = por %p2406_p10, %p2405_p5 }
  0x25   : > { %p2401_p6 = pneg %p2400_p9 }
  0x27   : > { %p2408_p1 = pnand %p2407_p13, %p2401_p6 }
  0x29   : > { %2411 = shalt.err (!%p2408_p1)
}
  0x2a   : > { %s2485_s8 = smov [#allocation5]   ;;  %p3855_p2 = scmp.ne.s32.totalorder %s3853_s24, 0 }
  0x2b   : > { %2324 = dma.vmem_to_smem (!%p2574_p12), %s142_s30, 16, %s2485_s8, [#allocation6]  }
  0x2c   : > { %162 = sbr.rel (%p3855_p2) target bundleno = 488 (0x1e8), region = 32 }
  0x33   : > { %p3856_p3 = scmp.eq.s32.totalorder %s2532_s16, 0 }
  0x35   : > { %2457 = dma.done.wait (%p3856_p3), [#allocation4], 16   ;;  %p3857_p4 = pmov %p3856_p3 }
  0x36   : > { %p3858_p9 = pmov %p3856_p3 }
  0x37   : > { %2459 = vsyncadd (%p3857_p4), [#allocation4], 4294967280 }
  0x38   : > { %2461 = dma.done.wait (%p3858_p9), [#allocation6], 16   ;;  %p3859_p5 = pmov %p3856_p3 }
  0x3a   : > { %2463 = vsyncadd (%p3859_p5), [#allocation6], 4294967280 }
  0x3b   : > { %172 = sfence }
  0x3c   : > { %p191_p6 = scmp.lt.s32.totalorder %s2532_s16, 1  ;;  %s2179_s9 = sld [smem:[#allocation2 + $0xd]]  ;;  %vm318_vm0 = vcmask 1046528   ;;  %vm496_vm1 = vcmask 1045504   ;;  %vm2050_vm2 = vcmask 130048  }
  0x3d   : > { %s2178_s10 = sld [smem:[#allocation2 + $0xc]]  ;;  %s2180_s17 = sld [smem:[#allocation2 + $0xe]] }
  0x3e   : > { %s192_s11 = scalar_select %p191_p6, %s2532_s16, 1 }
  0x3f   : > { %s2181_s26 = sld [smem:[#allocation2 + $0x18]]  ;;  %s2486_s27 = smov 127  }
  0x40   : > { %s2306_s19 = smul.u32 96, %s192_s11  ;;  %s2182_s28 = sld [smem:[#allocation2 + $0x19]] }
  0x41   : > { %s2187_s29 = sld [smem:[#allocation2 + $0x30]]  ;;  %s2183_s30 = sld [smem:[#allocation2 + $0x1a]] }
  0x42   : > { %s2599_s25 = scalar_lea.vmem %s3844_s0, %s2306_s19  ;;  %v241_v2 = vstv %s2179_s9  ;;  %s2188_s4 = sld [smem:[#allocation2 + $0x31]] }
  0x43   : > { %v2602_v0 = vld [vmem:[%s2599_s25] sm:$0xff]  ;;  %v2605_v1 = vld [vmem:[%s2599_s25 + $0x8] sm:$0xff]  ;;  %v227_v3 = vstv %s2178_s10  ;;  %v255_v8 = vstv %s2180_s17  ;;  %s2189_s5 = sld [smem:[#allocation2 + $0x32]]  ;;  %s2487_s6 = smov 126  }
  0x44   : > { %v242_v4 = vmul.f32 %v241_v2, %v2602_v0  ;;  %v228_v5 = vmul.f32 %v227_v3, %v2602_v0  ;;  %v243_v6 = vmul.f32 %v241_v2, %v2605_v1  ;;  %v229_v7 = vmul.f32 %v227_v3, %v2605_v1  ;;  %v2622_v15 = vld [vmem:[%s2599_s25 + $0x10] sm:$0x3]  ;;  %s2190_s7 = sld [smem:[#allocation2 + $0x3c]]  ;;  %s2191_s8 = sld [smem:[#allocation2 + $0x3d]] }
  0x45   : > { %v257_v9 = vmul.f32 %v255_v8, %v2605_v1  ;;  %v256_v10 = vmul.f32 %v255_v8, %v2602_v0  ;;  %v269_v11 = vstv %s2181_s26  ;;  %s2192_s9 = sld [smem:[#allocation2 + $0x3e]]  ;;  %s2196_s10 = sld [smem:[#allocation2 + $0x54]] }
  0x46   : > { %246 = vrot.lane.b32.xlu1 %v242_v4, %s2486_s27  ;;  %232 = vrot.lane.b32.xlu0 %v228_v5, %s2486_s27  ;;  %v271_v12 = vmul.f32 %v269_v11, %v2605_v1  ;;  %v270_v13 = vmul.f32 %v269_v11, %v2602_v0  ;;  %v283_v14 = vstv %s2182_s28  ;;  %s2197_s11 = sld [smem:[#allocation2 + $0x55]]  ;;  %s2198_s17 = sld [smem:[#allocation2 + $0x56]] }
  0x47   : > { %v363_v16 = vstv %s2187_s29  ;;  %v285_v17 = vmul.f32 %v283_v14, %v2605_v1  ;;  %v284_v18 = vmul.f32 %v283_v14, %v2602_v0  ;;  %v297_v19 = vstv %s2183_s30  ;;  %s2199_s19 = sld [smem:[#allocation2 + $0x60]]  ;;  %s2200_s20 = sld [smem:[#allocation2 + $0x61]] }
  0x48   : > { %v365_v20 = vmul.f32 %v363_v16, %v2605_v1  ;;  %v366_v21 = vmul.f32 %v363_v16, %v2622_v15  ;;  %v364_v22 = vmul.f32 %v363_v16, %v2602_v0  ;;  %v384_v23 = vstv %s2188_s4  ;;  %s2201_s24 = sld [smem:[#allocation2 + $0x62]]  ;;  %s2208_s26 = sld [smem:[#allocation2 + $0xf]] }
  0x49   : > { %v299_v24 = vmul.f32 %v297_v19, %v2605_v1  ;;  %v298_v25 = vmul.f32 %v297_v19, %v2602_v0  ;;  %v386_v26 = vmul.f32 %v384_v23, %v2605_v1  ;;  %v387_v27 = vmul.f32 %v384_v23, %v2622_v15  ;;  %s2209_s28 = sld [smem:[#allocation2 + $0x10]]  ;;  %s2210_s29 = sld [smem:[#allocation2 + $0x11]] }
  0x4a   : > { %248 = vrot.lane.b32.xlu1 %v243_v6, %s2486_s27  ;;  %234 = vrot.lane.b32.xlu0 %v229_v7, %s2486_s27  ;;  %v405_v28 = vstv %s2189_s5  ;;  %v371_v29 = vrot.slane %v365_v20, 1  ;;  %v373_v30 = vrot.slane %v366_v21, 1  ;;  %v370_v31 = vrot.slane %v364_v22, 1  ;;  %s2211_s30 = sld [smem:[#allocation2 + $0x1b]]  ;;  %s2212_s4 = sld [smem:[#allocation2 + $0x1c]] }
  0x4b   : > { %v385_v32 = vmul.f32 %v384_v23, %v2602_v0  ;;  %v407_v33 = vmul.f32 %v405_v28, %v2605_v1  ;;  %v392_v34 = vrot.slane %v386_v26, 1  ;;  %v394_v35 = vrot.slane %v387_v27, 1  ;;  %s2217_s5 = sld [smem:[#allocation2 + $0x33]]  ;;  %p3920_p12 = scmp.ne.s32.totalorder %s3851_s22, 0 }
  0x4c   : > { %v408_v36 = vmul.f32 %v405_v28, %v2622_v15  ;;  %v426_v37 = vstv %s2190_s7  ;;  %v374_v38 = vsel %vm318_vm0, %v371_v29, %v373_v30  ;;  %v372_v39 = vsel %vm318_vm0, %v370_v31, %v371_v29  ;;  %s2213_s7 = sld [smem:[#allocation2 + $0x1d]] }
  0x4d   : > { %v391_v40 = vrot.slane %v385_v32, 1  ;;  %v406_v41 = vmul.f32 %v405_v28, %v2602_v0  ;;  %v413_v42 = vrot.slane %v407_v33, 1  ;;  %v428_v43 = vmul.f32 %v426_v37, %v2605_v1 }
  0x4e   : > { %262 = vrot.lane.b32.xlu1 %v257_v9, %s2486_s27  ;;  %260 = vrot.lane.b32.xlu0 %v256_v10, %s2486_s27  ;;  %v429_v44 = vmul.f32 %v426_v37, %v2622_v15  ;;  %v427_v45 = vmul.f32 %v426_v37, %v2602_v0  ;;  %v447_v46 = vstv %s2191_s8  ;;  %v395_v47 = vsel %vm318_vm0, %v392_v34, %v394_v35  ;;  %s2218_s8 = sld [smem:[#allocation2 + $0x34]] }
  0x4f   : > { %v393_v48 = vsel %vm318_vm0, %v391_v40, %v392_v34  ;;  %v415_v49 = vrot.slane %v408_v36, 1  ;;  %v412_v50 = vrot.slane %v406_v41, 1  ;;  %v449_v51 = vmul.f32 %v447_v46, %v2605_v1 }
  0x50   : > { %v450_v52 = vmul.f32 %v447_v46, %v2622_v15  ;;  %v434_v53 = vrot.slane %v428_v43, 1  ;;  %v436_v54 = vrot.slane %v429_v44, 1  ;;  %v433_v55 = vrot.slane %v427_v45, 1 }
  0x51   : > { %v416_v56 = vsel %vm318_vm0, %v413_v42, %v415_v49  ;;  %v414_v57 = vsel %vm318_vm0, %v412_v50, %v413_v42  ;;  %v448_v58 = vmul.f32 %v447_v46, %v2602_v0  ;;  %v468_v59 = vstv %s2192_s9  ;;  %s2219_s9 = sld [smem:[#allocation2 + $0x35]] }
  0x52   : > { %276 = vrot.lane.b32.xlu1 %v271_v12, %s2487_s6  ;;  %274 = vrot.lane.b32.xlu0 %v270_v13, %s2487_s6  ;;  %v455_v60 = vrot.slane %v449_v51, 1  ;;  %v457_v61 = vrot.slane %v450_v52, 1  ;;  %v437_v62 = vsel %vm318_vm0, %v434_v53, %v436_v54  ;;  %v435_v63 = vsel %vm318_vm0, %v433_v55, %v434_v53 }
  0x53   : > { %v470_v2 = vmul.f32 %v468_v59, %v2605_v1  ;;  %v454_v3 = vrot.slane %v448_v58, 1  ;;  %v471_v4 = vmul.f32 %v468_v59, %v2622_v15  ;;  %v469_v5 = vmul.f32 %v468_v59, %v2602_v0 }
  0x54   : > { %v541_v6 = vstv %s2196_s10  ;;  %v458_v7 = vsel %vm318_vm0, %v455_v60, %v457_v61  ;;  %v562_v11 = vstv %s2197_s11  ;;  %v604_v30 = vstv %s2199_s19  ;;  %s2220_s10 = sld [smem:[#allocation2 + $0x3f]]  ;;  %s2221_s11 = sld [smem:[#allocation2 + $0x40]] }
  0x55   : > { %v476_v8 = vrot.slane %v470_v2, 1  ;;  %v543_v9 = vmul.f32 %v541_v6, %v2605_v1  ;;  %v544_v10 = vmul.f32 %v541_v6, %v2622_v15  ;;  %v456_v12 = vsel %vm318_vm0, %v454_v3, %v455_v60  ;;  %s2226_s19 = sld [smem:[#allocation2 + $0x57]] }
  0x56   : > { %290 = vrot.lane.b32.xlu1 %v285_v17, %s2487_s6  ;;  %288 = vrot.lane.b32.xlu0 %v284_v18, %s2487_s6  ;;  %v478_v13 = vrot.slane %v471_v4, 1  ;;  %v475_v14 = vrot.slane %v469_v5, 1  ;;  %v542_v16 = vmul.f32 %v541_v6, %v2602_v0  ;;  %v564_v17 = vmul.f32 %v562_v11, %v2605_v1  ;;  %v2717_v6 = vld [vmem:[%s2599_s25 + $0x20] sm:$0xff] }
  0x57   : > { %v565_v18 = vmul.f32 %v562_v11, %v2622_v15  ;;  %v549_v19 = vrot.slane %v543_v9, 2  ;;  %v551_v20 = vrot.slane %v544_v10, 2  ;;  %v563_v21 = vmul.f32 %v562_v11, %v2602_v0 }
  0x58   : > { %v479_v22 = vsel %vm318_vm0, %v476_v8, %v478_v13  ;;  %v477_v23 = vsel %vm318_vm0, %v475_v14, %v476_v8  ;;  %v570_v26 = vrot.slane %v564_v17, 2  ;;  %v606_v36 = vmul.f32 %v604_v30, %v2605_v1  ;;  %v2720_v8 = vld [vmem:[%s2599_s25 + $0x18] sm:$0xff] }
  0x59   : > { %v572_v27 = vrot.slane %v565_v18, 2  ;;  %v552_v28 = vsel %vm496_vm1, %v549_v19, %v551_v20  ;;  %v569_v29 = vrot.slane %v563_v21, 2  ;;  %v625_v43 = vstv %s2200_s20  ;;  %s2227_s20 = sld [smem:[#allocation2 + $0x58]] }
  0x5a   : > { %304 = vrot.lane.b32.xlu1 %v299_v24, %s2487_s6  ;;  %302 = vrot.lane.b32.xlu0 %v298_v25, %s2487_s6  ;;  %v548_v24 = vrot.slane %v542_v16, 2  ;;  %v583_v25 = vstv %s2198_s17  ;;  %v612_v44 = vrot.slane %v606_v36, 2  ;;  %v626_v51 = vmul.f32 %v625_v43, %v2602_v0  ;;  %s2222_s17 = sld [smem:[#allocation2 + $0x41]] }
  0x5b   : > { %v585_v32 = vmul.f32 %v583_v25, %v2605_v1  ;;  %v586_v33 = vmul.f32 %v583_v25, %v2622_v15  ;;  %v584_v34 = vmul.f32 %v583_v25, %v2602_v0  ;;  %v573_v35 = vsel %vm496_vm1, %v570_v26, %v572_v27 }
  0x5c   : > { %v550_v31 = vsel %vm496_vm1, %v548_v24, %v549_v19  ;;  %v571_v37 = vsel %vm496_vm1, %v569_v29, %v570_v26  ;;  %v646_v52 = vstv %s2201_s24  ;;  %v703_v11 = vstv %s2209_s28  ;;  %s2228_s24 = sld [smem:[#allocation2 + $0x59]]  ;;  %s2230_s28 = sld [smem:[#allocation2 + $0x64]] }
  0x5d   : > { %v591_v40 = vrot.slane %v585_v32, 2  ;;  %v593_v41 = vrot.slane %v586_v33, 2  ;;  %v590_v42 = vrot.slane %v584_v34, 2  ;;  %v648_v58 = vmul.f32 %v646_v52, %v2605_v1 }
  0x5e   : > { %377 = vrot.lane.b32.xlu1 %v374_v38, %s2486_s27  ;;  %375 = vrot.lane.b32.xlu0 %v372_v39, %s2486_s27  ;;  %v607_v38 = vmul.f32 %v604_v30, %v2622_v15  ;;  %v605_v39 = vmul.f32 %v604_v30, %v2602_v0  ;;  %v649_v59 = vmul.f32 %v646_v52, %v2622_v15  ;;  %v717_v14 = vstv %s2210_s29  ;;  %s2231_s29 = sld [smem:[#allocation2 + $0x65]] }
  0x5f   : > { %v594_v49 = vsel %vm496_vm1, %v591_v40, %v593_v41  ;;  %v592_v50 = vsel %vm496_vm1, %v590_v42, %v591_v40  ;;  %v647_v60 = vmul.f32 %v646_v52, %v2602_v0  ;;  %v704_v13 = vmul.f32 %v2720_v8, %v703_v11 }
  0x60   : > { %v614_v45 = vrot.slane %v607_v38, 2  ;;  %v611_v46 = vrot.slane %v605_v39, 2  ;;  %v656_v2 = vrot.slane %v649_v59, 2  ;;  %v719_v16 = vmul.f32 %v2717_v6, %v717_v14 }
  0x61   : > { %v653_v3 = vrot.slane %v647_v60, 2  ;;  %v718_v17 = vmul.f32 %v2720_v8, %v717_v14  ;;  %v731_v18 = vstv %s2211_s30  ;;  %v745_v21 = vstv %s2212_s4  ;;  %s2834_s30 = sld [smem:[#allocation2 + $0x1]]  ;;  %s2840_s4 = sld [smem:[#allocation2]] }
  0x62   : > { %398 = vrot.lane.b32.xlu1 %v395_v47, %s2486_s27  ;;  %396 = vrot.lane.b32.xlu0 %v393_v48, %s2486_s27  ;;  %v627_v47 = vmul.f32 %v625_v43, %v2605_v1  ;;  %v628_v48 = vmul.f32 %v625_v43, %v2622_v15  ;;  %v615_v53 = vsel %vm496_vm1, %v612_v44, %v614_v45  ;;  %v759_v26 = vstv %s2213_s7  ;;  %s2851_s7 = sld [smem:[#allocation5 + $0x1]] }
  0x63   : > { %v613_v54 = vsel %vm496_vm1, %v611_v46, %v612_v44  ;;  %v733_v19 = vmul.f32 %v2717_v6, %v731_v18  ;;  %v732_v20 = vmul.f32 %v2720_v8, %v731_v18  ;;  %v747_v24 = vmul.f32 %v2717_v6, %v745_v21 }
  0x64   : > { %v633_v55 = vrot.slane %v627_v47, 2  ;;  %v746_v25 = vmul.f32 %v2720_v8, %v745_v21  ;;  %v845_v30 = vstv %s2218_s8  ;;  %v760_v32 = vmul.f32 %v2720_v8, %v759_v26  ;;  %s2853_s8 = sld [smem:[#allocation5]] }
  0x65   : > { %v847_v33 = vmul.f32 %v2717_v6, %v845_v30  ;;  %v846_v39 = vmul.f32 %v2720_v8, %v845_v30 }
  0x66   : > { %419 = vrot.lane.b32.xlu1 %v416_v56, %s2486_s27  ;;  %417 = vrot.lane.b32.xlu0 %v414_v57, %s2486_s27  ;;  %v635_v56 = vrot.slane %v628_v48, 2  ;;  %v632_v57 = vrot.slane %v626_v51, 2  ;;  %v887_v48 = vstv %s2220_s10  ;;  %s2184_s10 = sld [smem:[#allocation2 + $0x24]] }
  0x67   : > { %v853_v41 = vrot.slane %v847_v33, 1  ;;  %v852_v47 = vrot.slane %v846_v39, 1  ;;  %v889_v52 = vmul.f32 %v2717_v6, %v887_v48 }
  0x68   : > { %v636_v61 = vsel %vm496_vm1, %v633_v55, %v635_v56 }
  0x6a   : > { %440 = vrot.lane.b32.xlu1 %v437_v62, %s2487_s6  ;;  %438 = vrot.lane.b32.xlu0 %v435_v63, %s2487_s6  ;;  %v634_v62 = vsel %vm496_vm1, %v632_v57, %v633_v55  ;;  %v654_v63 = vrot.slane %v648_v58, 2  ;;  %v854_v55 = vsel %vm318_vm0, %v852_v47, %v853_v41  ;;  %v888_v57 = vmul.f32 %v2720_v8, %v887_v48 }
  0x6c   : > { %v657_v4 = vsel %vm496_vm1, %v654_v63, %v656_v2  ;;  %v655_v5 = vsel %vm496_vm1, %v653_v3, %v654_v63  ;;  %v894_v2 = vrot.slane %v888_v57, 1  ;;  %v1085_v57 = vstv %s2230_s28  ;;  %s2912_s28 = sld [smem:[#allocation2 + $0x48]] }
  0x6e   : > { %461 = vrot.lane.b32.xlu1 %v458_v7, %s2487_s6  ;;  %459 = vrot.lane.b32.xlu0 %v456_v12, %s2487_s6  ;;  %v689_v7 = vstv %s2208_s26  ;;  %v705_v12 = vmul.f32 %v2717_v6, %v703_v11  ;;  %v1001_v11 = vstv %s2226_s19  ;;  %s2229_s26 = sld [smem:[#allocation2 + $0x63]]  ;;  %s2872_s19 = sld [smem:[#allocation2 + $0x26]] }
  0x6f   : > { %v691_v9 = vmul.f32 %v2717_v6, %v689_v7  ;;  %v690_v10 = vmul.f32 %v2720_v8, %v689_v7 }
  0x72   : > { %482 = vrot.lane.b32.xlu1 %v479_v22, %s2487_s6  ;;  %480 = vrot.lane.b32.xlu0 %v477_v23, %s2487_s6  ;;  %v2739_v22 = vld [vmem:[%s2599_s25 + $0x28] sm:$0x3]  ;;  %v824_v23 = vstv %s2217_s5  ;;  %s2845_s5 = sld [smem:[#allocation2 + $0x12]] }
  0x73   : > { %v826_v27 = vmul.f32 %v2717_v6, %v824_v23  ;;  %v825_v29 = vmul.f32 %v2720_v8, %v824_v23  ;;  %v848_v34 = vmul.f32 %v2739_v22, %v845_v30  ;;  %v890_v56 = vmul.f32 %v2739_v22, %v887_v48 }
  0x74   : > { %v1004_v18 = vmul.f32 %v2739_v22, %v1001_v11 }
  0x75   : > { %v832_v36 = vrot.slane %v826_v27, 1  ;;  %v831_v38 = vrot.slane %v825_v29, 1  ;;  %v855_v42 = vrot.slane %v848_v34, 1  ;;  %v897_v63 = vrot.slane %v890_v56, 1 }
  0x76   : > { %555 = vrot.lane.b32.xlu1 %v552_v28, %s2486_s27  ;;  %553 = vrot.lane.b32.xlu0 %v550_v31, %s2486_s27  ;;  %v827_v28 = vmul.f32 %v2739_v22, %v824_v23  ;;  %v761_v31 = vmul.f32 %v2717_v6, %v759_v26  ;;  %v1022_v26 = vstv %s2227_s20  ;;  %s2884_s20 = sld [smem:[#allocation2 + $0x14]] }
  0x77   : > { %v833_v46 = vsel %vm318_vm0, %v831_v38, %v832_v36  ;;  %v1024_v30 = vmul.f32 %v2717_v6, %v1022_v26  ;;  %v1023_v34 = vmul.f32 %v2720_v8, %v1022_v26 }
  0x79   : > { %v1030_v39 = vrot.slane %v1024_v30, 2  ;;  %v215_v30 = vstv %s2834_s30  ;;  %s2935_s30 = sld [smem:[#allocation2 + $0x36]] }
  0x7a   : > { %576 = vrot.lane.b32.xlu1 %v573_v35, %s2486_s27  ;;  %574 = vrot.lane.b32.xlu0 %v571_v37, %s2486_s27  ;;  %v866_v35 = vstv %s2219_s9  ;;  %v834_v37 = vrot.slane %v827_v28, 1  ;;  %v1011_v28 = vrot.slane %v1004_v18, 2  ;;  %s2859_s9 = sld [smem:[#allocation2 + $0x13]] }
  0x7b   : > { %v868_v40 = vmul.f32 %v2717_v6, %v866_v35  ;;  %v869_v43 = vmul.f32 %v2739_v22, %v866_v35  ;;  %v867_v44 = vmul.f32 %v2720_v8, %v866_v35  ;;  %v1043_v35 = vstv %s2228_s24  ;;  %s2893_s24 = sld [smem:[#allocation5 + $0x2]] }
  0x7c   : > { %v835_v45 = vsel %vm318_vm0, %v832_v36, %v834_v37 }
  0x7d   : > { %v873_v51 = vrot.slane %v867_v44, 1  ;;  %v1029_v44 = vrot.slane %v1023_v34, 2  ;;  %v2878_v34 = vld [vmem:[%s2599_s25 + $0x38] sm:$0xff] }
  0x7e   : > { %597 = vrot.lane.b32.xlu1 %v594_v49, %s2486_s27  ;;  %595 = vrot.lane.b32.xlu0 %v592_v50, %s2486_s27  ;;  %v874_v49 = vrot.slane %v868_v40, 1  ;;  %v876_v50 = vrot.slane %v869_v43, 1 }
  0x80   : > { %v877_v59 = vsel %vm318_vm0, %v874_v49, %v876_v50  ;;  %v875_v60 = vsel %vm318_vm0, %v873_v51, %v874_v49 }
  0x82   : > { %618 = vrot.lane.b32.xlu1 %v615_v53, %s2487_s6  ;;  %616 = vrot.lane.b32.xlu0 %v613_v54, %s2487_s6  ;;  %v908_v53 = vstv %s2221_s11  ;;  %v856_v54 = vsel %vm318_vm0, %v853_v41, %v855_v42  ;;  %v1045_v41 = vmul.f32 %v2717_v6, %v1043_v35  ;;  %v1064_v42 = vstv %s2229_s26  ;;  %s2865_s11 = sld [smem:[#allocation2 + $0x2]]  ;;  %s2901_s26 = sld [smem:[#allocation2 + $0x1e]] }
  0x83   : > { %v910_v58 = vmul.f32 %v2717_v6, %v908_v53  ;;  %v909_v3 = vmul.f32 %v2720_v8, %v908_v53  ;;  %v1066_v49 = vmul.f32 %v2717_v6, %v1064_v42 }
  0x84   : > { %v1051_v51 = vrot.slane %v1045_v41, 2  ;;  %v216_v41 = vmul.f32 %v215_v30, %v2602_v0 }
  0x85   : > { %v915_v14 = vrot.slane %v909_v3, 1 }
  0x86   : > { %639 = vrot.lane.b32.xlu1 %v636_v61, %s2487_s6  ;;  %637 = vrot.lane.b32.xlu0 %v634_v62, %s2487_s6  ;;  %v895_v61 = vrot.slane %v889_v52, 1  ;;  %v911_v62 = vmul.f32 %v2739_v22, %v908_v53  ;;  %v1067_v52 = vmul.f32 %v2739_v22, %v1064_v42  ;;  %v1065_v53 = vmul.f32 %v2720_v8, %v1064_v42 }
  0x87   : > { %v200_v42 = vstv %s2851_s7  ;;  %s2952_s7 = sld [smem:[#allocation2 + $0x37]] }
  0x88   : > { %v918_v7 = vrot.slane %v911_v62, 1  ;;  %v1071_v62 = vrot.slane %v1065_v53, 2  ;;  %v2907_v53 = vadd.f32 %v216_v41, %v200_v42 }
  0x8a   : > { %660 = vrot.lane.b32.xlu1 %v657_v4, %s2487_s6  ;;  %658 = vrot.lane.b32.xlu0 %v655_v5, %s2487_s6  ;;  %v929_v4 = vstv %s2222_s17  ;;  %v916_v5 = vrot.slane %v910_v58, 1  ;;  %s2867_s17 = sld [smem:[#allocation2 + $0x25]] }
  0x8c   : > { %v917_v23 = vsel %vm318_vm0, %v915_v14, %v916_v5 }
  0x8e   : > { %696 = vrot.lane.b32.xlu1 %v691_v9, %s2486_s27  ;;  %694 = vrot.lane.b32.xlu0 %v690_v10, %s2486_s27  ;;  %v931_v9 = vmul.f32 %v2717_v6, %v929_v4  ;;  %v932_v10 = vmul.f32 %v2739_v22, %v929_v4 }
  0x90   : > { %v939_v21 = vrot.slane %v932_v10, 1  ;;  %v1106_v10 = vstv %s2231_s29  ;;  %s2925_s29 = sld [smem:[#allocation2 + $0x1f]] }
  0x91   : > { %v1109_v18 = vmul.f32 %v2739_v22, %v1106_v10 }
  0x92   : > { %710 = vrot.lane.b32.xlu1 %v705_v12, %s2486_s27  ;;  %708 = vrot.lane.b32.xlu0 %v704_v13, %s2486_s27  ;;  %v898_v12 = vsel %vm318_vm0, %v895_v61, %v897_v63  ;;  %v896_v13 = vsel %vm318_vm0, %v894_v2, %v895_v61  ;;  %v1074_v61 = vrot.slane %v1067_v52, 2  ;;  %v1087_v63 = vmul.f32 %v2717_v6, %v1085_v57 }
  0x93   : > { %v1088_v2 = vmul.f32 %v2739_v22, %v1085_v57 }
  0x95   : > { %v1095_v14 = vrot.slane %v1088_v2, 2 }
  0x96   : > { %724 = vrot.lane.b32.xlu1 %v719_v16, %s2486_s27  ;;  %722 = vrot.lane.b32.xlu0 %v718_v17, %s2486_s27  ;;  %v930_v16 = vmul.f32 %v2720_v8, %v929_v4  ;;  %v1003_v17 = vmul.f32 %v2717_v6, %v1001_v11 }
  0x98   : > { %v1009_v27 = vrot.slane %v1003_v17, 2  ;;  %v1108_v17 = vmul.f32 %v2717_v6, %v1106_v10 }
  0x9a   : > { %738 = vrot.lane.b32.xlu1 %v733_v19, %s2487_s6  ;;  %736 = vrot.lane.b32.xlu0 %v732_v20, %s2487_s6  ;;  %v919_v19 = vsel %vm318_vm0, %v916_v5, %v918_v7  ;;  %v937_v20 = vrot.slane %v931_v9, 1  ;;  %v1012_v38 = vsel %vm496_vm1, %v1009_v27, %v1011_v28  ;;  %v1086_v5 = vmul.f32 %v2720_v8, %v1085_v57 }
  0x9c   : > { %v940_v29 = vsel %vm318_vm0, %v937_v20, %v939_v21 }
  0x9e   : > { %752 = vrot.lane.b32.xlu1 %v747_v24, %s2487_s6  ;;  %750 = vrot.lane.b32.xlu0 %v746_v25, %s2487_s6  ;;  %v936_v24 = vrot.slane %v930_v16, 1  ;;  %v1002_v25 = vmul.f32 %v2720_v8, %v1001_v11  ;;  %v1092_v16 = vrot.slane %v1086_v5, 2 }
  0xa0   : > { %v1008_v33 = vrot.slane %v1002_v25, 2  ;;  %v1114_v25 = vrot.slane %v1108_v17, 2 }
  0xa2   : > { %766 = vrot.lane.b32.xlu1 %v761_v31, %s2487_s6  ;;  %764 = vrot.lane.b32.xlu0 %v760_v32, %s2487_s6  ;;  %v1025_v31 = vmul.f32 %v2739_v22, %v1022_v26  ;;  %v938_v32 = vsel %vm318_vm0, %v936_v24, %v937_v20  ;;  %v1010_v43 = vsel %vm496_vm1, %v1008_v33, %v1009_v27  ;;  %v1116_v26 = vrot.slane %v1109_v18, 2 }
  0xa4   : > { %v1032_v40 = vrot.slane %v1025_v31, 2  ;;  %v209_v31 = vstv %s2840_s4  ;;  %s2941_s4 = sld [smem:[#allocation2 + $0x49]] }
  0xa5   : > { %v211_v5 = vmul.f32 %v209_v31, %v2605_v1 }
  0xa6   : > { %838 = vrot.lane.b32.xlu1 %v835_v45, %s2486_s27  ;;  %836 = vrot.lane.b32.xlu0 %v833_v46, %s2486_s27  ;;  %v1046_v45 = vmul.f32 %v2739_v22, %v1043_v35  ;;  %v1044_v46 = vmul.f32 %v2720_v8, %v1043_v35  ;;  %v1033_v50 = vsel %vm496_vm1, %v1030_v39, %v1032_v40  ;;  %v1149_v35 = vstv %s2845_s5  ;;  %s2949_s5 = sld [smem:[#allocation2 + $0x20]] }
  0xa8   : > { %v1050_v56 = vrot.slane %v1044_v46, 2  ;;  %v197_v46 = vstv %s2853_s8  ;;  %s2963_s8 = sld [smem:[#allocation2 + $0x4a]] }
  0xaa   : > { %859 = vrot.lane.b32.xlu1 %v856_v54, %s2486_s27  ;;  %857 = vrot.lane.b32.xlu0 %v854_v55, %s2486_s27  ;;  %v1031_v54 = vsel %vm496_vm1, %v1029_v44, %v1030_v39  ;;  %v1053_v55 = vrot.slane %v1046_v45, 2  ;;  %v1052_v4 = vsel %vm496_vm1, %v1050_v56, %v1051_v51  ;;  %v1151_v44 = vmul.f32 %v2878_v34, %v1149_v35 }
  0xab   : > { %v329_v56 = vstv %s2867_s17  ;;  %s3056_s17 = sld [smem:[#allocation2 + $0x44]] }
  0xac   : > { %v1054_v3 = vsel %vm496_vm1, %v1051_v51, %v1053_v55  ;;  %v221_v55 = vstv %s2865_s11  ;;  %v330_v17 = vmul.f32 %v329_v56, %v2602_v0  ;;  %s3030_s11 = sld [smem:[#allocation2 + $0x43]] }
  0xae   : > { %880 = vrot.lane.b32.xlu1 %v877_v59, %s2486_s27  ;;  %878 = vrot.lane.b32.xlu0 %v875_v60, %s2486_s27  ;;  %v1072_v60 = vrot.slane %v1066_v49, 2  ;;  %v1163_v49 = vstv %s2859_s9  ;;  %s2971_s9 = sld [smem:[#allocation2 + $0x38]] }
  0xb0   : > { %v1075_v11 = vsel %vm496_vm1, %v1072_v60, %v1074_v61  ;;  %v1165_v61 = vmul.f32 %v2878_v34, %v1163_v49 }
  0xb2   : > { %901 = vrot.lane.b32.xlu1 %v898_v12, %s2487_s6  ;;  %899 = vrot.lane.b32.xlu0 %v896_v13, %s2487_s6  ;;  %v1073_v12 = vsel %vm496_vm1, %v1071_v62, %v1072_v60  ;;  %v1093_v13 = vrot.slane %v1087_v63, 2  ;;  %v346_v60 = vstv %s2872_s19  ;;  %s3062_s19 = sld [smem:[#allocation2 + $0x3]] }
  0xb3   : > { %v348_v18 = vmul.f32 %v346_v60, %v2605_v1 }
  0xb4   : > { %v1094_v24 = vsel %vm496_vm1, %v1092_v16, %v1093_v13  ;;  %v222_v16 = vmul.f32 %v221_v55, %v2602_v0 }
  0xb6   : > { %922 = vrot.lane.b32.xlu1 %v919_v19, %s2487_s6  ;;  %920 = vrot.lane.b32.xlu0 %v917_v23, %s2487_s6  ;;  %v1107_v19 = vmul.f32 %v2720_v8, %v1106_v10  ;;  %v1096_v23 = vsel %vm496_vm1, %v1093_v13, %v1095_v14  ;;  %v223_v10 = vmul.f32 %v221_v55, %v2605_v1 }
  0xb8   : > { %v2797_v36 = vpop.permute.xlu1 %246  ;;  %v2799_v37 = vpop.permute.xlu0 %232  ;;  %v1113_v27 = vrot.slane %v1107_v19, 2  ;;  %v349_v19 = vmul.f32 %v346_v60, %v2622_v15 }
  0xba   : > { %943 = vrot.lane.b32.xlu1 %v940_v29, %s2487_s6  ;;  %941 = vrot.lane.b32.xlu0 %v938_v32, %s2487_s6  ;;  %v1117_v32 = vsel %vm496_vm1, %v1114_v25, %v1116_v26  ;;  %v1115_v33 = vsel %vm496_vm1, %v1113_v27, %v1114_v25  ;;  %v356_v55 = vrot.slane %v349_v19, 1 }
  0xbc   : > { %v2808_v47 = vpop.permute.xlu1 %248  ;;  %v2810_v48 = vpop.permute.xlu0 %234 }
  0xbe   : > { %1015 = vrot.lane.b32.xlu1 %v1012_v38, %s2486_s27  ;;  %1013 = vrot.lane.b32.xlu0 %v1010_v43, %s2486_s27  ;;  %v2882_v38 = vld [vmem:[%s2599_s25 + $0x30] sm:$0xff]  ;;  %v210_v43 = vmul.f32 %v209_v31, %v2602_v0 }
  0xbf   : > { %v1150_v45 = vmul.f32 %v2882_v38, %v1149_v35  ;;  %v1164_v62 = vmul.f32 %v2882_v38, %v1163_v49  ;;  %v2956_v35 = vadd.f32 %v211_v5, %v197_v46  ;;  %v336_v49 = vrot.slane %v330_v17, 1 }
  0xc0   : > { %v2819_v58 = vpop.permute.xlu1 %262  ;;  %v2821_v59 = vpop.permute.xlu0 %260  ;;  %v2914_v57 = vadd.f32 %v210_v43, %v197_v46 }
  0xc2   : > { %1036 = vrot.lane.b32.xlu1 %v1033_v50, %s2486_s27  ;;  %1034 = vrot.lane.b32.xlu0 %v1031_v54, %s2486_s27  ;;  %v311_v50 = vstv %s2184_s10  ;;  %v217_v54 = vmul.f32 %v215_v30, %v2605_v1  ;;  %s3005_s10 = sld [smem:[#allocation2 + $0x42]] }
  0xc3   : > { %v313_v63 = vmul.f32 %v311_v50, %v2605_v1  ;;  %v314_v2 = vmul.f32 %v311_v50, %v2622_v15 }
  0xc4   : > { %v2830_v7 = vpop.permute.xlu1 %276  ;;  %v2832_v9 = vpop.permute.xlu0 %274 }
  0xc5   : > { %v320_v27 = vrot.slane %v313_v63, 1  ;;  %v322_v30 = vrot.slane %v314_v2, 1  ;;  %v1205_v2 = vstv %s2925_s29  ;;  %s3109_s29 = sld [smem:[#allocation2 + $0x5]] }
  0xc6   : > { %1057 = vrot.lane.b32.xlu1 %v1054_v3, %s2486_s27  ;;  %1055 = vrot.lane.b32.xlu0 %v1052_v4, %s2486_s27  ;;  %v312_v3 = vmul.f32 %v311_v50, %v2602_v0  ;;  %v1177_v4 = vstv %s2884_s20  ;;  %v354_v50 = vrot.slane %v348_v18, 1  ;;  %s3064_s20 = sld [smem:[#allocation2 + $0x5a]] }
  0xc7   : > { %v1179_v25 = vmul.f32 %v2878_v34, %v1177_v4  ;;  %v1178_v26 = vmul.f32 %v2882_v38, %v1177_v4 }
  0xc8   : > { %v2847_v20 = vpop.permute.xlu1 %290  ;;  %v2849_v21 = vpop.permute.xlu0 %288  ;;  %v319_v31 = vrot.slane %v312_v3, 1  ;;  %v3001_v18 = vsel %vm318_vm0, %v354_v50, %v356_v55 }
  0xca   : > { %1078 = vrot.lane.b32.xlu1 %v1075_v11, %s2487_s6  ;;  %1076 = vrot.lane.b32.xlu0 %v1073_v12, %s2487_s6  ;;  %v331_v11 = vmul.f32 %v329_v56, %v2605_v1  ;;  %v332_v12 = vmul.f32 %v329_v56, %v2622_v15  ;;  %v489_v56 = vstv %s2912_s28  ;;  %v2979_v63 = vsel %vm318_vm0, %v319_v31, %v320_v27  ;;  %s3100_s28 = sld [smem:[#allocation2 + $0x5c]] }
  0xcb   : > { %v490_v19 = vmul.f32 %v489_v56, %v2602_v0 }
  0xcc   : > { %v2861_v28 = vpop.permute.xlu1 %304  ;;  %v2863_v29 = vpop.permute.xlu0 %302  ;;  %v337_v41 = vrot.slane %v331_v11, 1  ;;  %v339_v43 = vrot.slane %v332_v12, 1  ;;  %v492_v11 = vmul.f32 %v489_v56, %v2622_v15  ;;  %v2994_v12 = vld [vmem:[%s2599_s25 + $0x40] sm:$0x3] }
  0xce   : > { %1099 = vrot.lane.b32.xlu1 %v1096_v23, %s2487_s6  ;;  %1097 = vrot.lane.b32.xlu0 %v1094_v24, %s2487_s6  ;;  %v203_v23 = vstv %s2893_s24  ;;  %v347_v24 = vmul.f32 %v346_v60, %v2602_v0  ;;  %v2983_v3 = vsel %vm318_vm0, %v337_v41, %v339_v43  ;;  %v2998_v17 = vsel %vm318_vm0, %v336_v49, %v337_v41  ;;  %s3071_s24 = sld [smem:[#allocation2 + $0x5b]] }
  0xcf   : > { %v2965_v60 = vadd.f32 %v223_v10, %v203_v23  ;;  %3863 = vst [vmem:[#allocation14_spill] sm:$0xff] %v2983_v3  ;;  %v2990_v10 = vmul.f32 %v489_v56, %v2605_v1  ;;  %3866 = vst [vmem:[#allocation17_spill] sm:$0xff] %v2998_v17  ;;  %v1305_v41 = vstv %s2952_s7  ;;  %v500_v55 = vrot.slane %v492_v11, 2  ;;  %v2372_v17 = vld [vmem:[%s2599_s25 + $0x8] sm:$0xff]  ;;  %s3185_s7 = sld [smem:[#allocation2 + $0x68]] }
  0xd0   : > { %v2886_v39 = vpop.permute.xlu1 %377  ;;  %v2888_v40 = vpop.permute.xlu0 %375  ;;  %v1308_v11 = vmul.f32 %v2994_v12, %v1305_v41 }
  0xd2   : > { %1120 = vrot.lane.b32.xlu1 %v1117_v32, %s2487_s6  ;;  %1118 = vrot.lane.b32.xlu0 %v1115_v33, %s2487_s6  ;;  %v1191_v32 = vstv %s2901_s26  ;;  %v2954_v33 = vadd.f32 %v217_v54, %v200_v42  ;;  %v353_v42 = vrot.slane %v347_v24, 1  ;;  %s3084_s26 = sld [smem:[#allocation2 + $0x4]] }
  0xd3   : > { %v1193_v46 = vmul.f32 %v2878_v34, %v1191_v32  ;;  %v1192_v54 = vmul.f32 %v2882_v38, %v1191_v32 }
  0xd4   : > { %v2903_v51 = vpop.permute.xlu1 %398  ;;  %v2905_v52 = vpop.permute.xlu0 %396  ;;  %v3008_v24 = vsel %vm318_vm0, %v353_v42, %v354_v50  ;;  %v498_v50 = vrot.slane %v2990_v10, 2 }
  0xd5   : > { %3860 = vst [vmem:[#allocation11_spill] sm:$0xff] %v2903_v51  ;;  %3861 = vst [vmem:[#allocation12_spill] sm:$0xff] %v2905_v52 }
  0xd6   : > { %1156 = vrot.lane.b32.xlu1 %v1151_v44, %s2486_s27  ;;  %1154 = vrot.lane.b32.xlu0 %v1150_v45, %s2486_s27  ;;  %v3043_v51 = vsel %vm496_vm1, %v498_v50, %v500_v55 }
  0xd7   : > { %3867 = vst [vmem:[#allocation18_spill] sm:$0xff] %v3043_v51 }
  0xd8   : > { %v2931_v13 = vpop.permute.xlu1 %419  ;;  %v2933_v14 = vpop.permute.xlu0 %417 }
  0xda   : > { %1170 = vrot.lane.b32.xlu1 %v1165_v61, %s2486_s27  ;;  %1168 = vrot.lane.b32.xlu0 %v1164_v62, %s2486_s27  ;;  %v2973_v61 = vadd.f32 %v222_v16, %v203_v23  ;;  %v2976_v62 = vsel %vm318_vm0, %v320_v27, %v322_v30  ;;  %v1284_v16 = vstv %s2935_s30  ;;  %v507_v23 = vstv %s2941_s4  ;;  %s3111_s30 = sld [smem:[#allocation2 + $0x66]]  ;;  %s3134_s4 = sld [smem:[#allocation2 + $0x67]] }
  0xdb   : > { %v1219_v27 = vstv %s2949_s5  ;;  %v1286_v30 = vmul.f32 %v2878_v34, %v1284_v16  ;;  %v1287_v31 = vmul.f32 %v2994_v12, %v1284_v16  ;;  %v1285_v32 = vmul.f32 %v2882_v38, %v1284_v16  ;;  %s3158_s5 = sld [smem:[#allocation2 + $0x27]] }
  0xdc   : > { %v2958_v44 = vpop.permute.xlu1 %440  ;;  %v2960_v45 = vpop.permute.xlu0 %438  ;;  %v3025_v56 = vmul.f32 %v507_v23, %v2605_v1  ;;  %v3028_v42 = vmul.f32 %v507_v23, %v2622_v15  ;;  %v524_v16 = vstv %s2963_s8  ;;  %v508_v10 = vmul.f32 %v507_v23, %v2602_v0  ;;  %s3192_s8 = sld [smem:[#allocation2 + $0x28]] }
  0xdd   : > { %3862 = vst [vmem:[#allocation13_spill] sm:$0xff] %v2960_v45  ;;  %v1307_v1 = vmul.f32 %v2878_v34, %v1305_v41  ;;  %v1291_v52 = vrot.slane %v1285_v32, 1  ;;  %v526_v3 = vmul.f32 %v2372_v17, %v524_v16  ;;  %v527_v45 = vmul.f32 %v524_v16, %v2622_v15 }
  0xde   : > { %1184 = vrot.lane.b32.xlu1 %v1179_v25, %s2486_s27  ;;  %1182 = vrot.lane.b32.xlu0 %v1178_v26, %s2486_s27  ;;  %v1207_v25 = vmul.f32 %v2878_v34, %v1205_v2  ;;  %v1206_v26 = vmul.f32 %v2882_v38, %v1205_v2  ;;  %v1220_v2 = vmul.f32 %v2882_v38, %v1219_v27  ;;  %v515_v0 = vrot.slane %v3025_v56, 2 }
  0xdf   : > { %v517_v23 = vrot.slane %v3028_v42, 2  ;;  %v1313_v55 = vrot.slane %v1307_v1, 1  ;;  %v1315_v56 = vrot.slane %v1308_v11, 1  ;;  %v514_v1 = vrot.slane %v508_v10, 2 }
  0xe0   : > { %v2985_v4 = vpop.permute.xlu1 %461  ;;  %v2987_v5 = vpop.permute.xlu0 %459  ;;  %v532_v51 = vrot.slane %v526_v3, 2 }
  0xe1   : > { %3864 = vst [vmem:[#allocation15_spill] sm:$0xff] %v2985_v4  ;;  %3865 = vst [vmem:[#allocation16_spill] sm:$0xff] %v2987_v5  ;;  %v1326_v5 = vstv %s2971_s9  ;;  %v1294_v4 = vrot.slane %v1287_v31, 1  ;;  %s3242_s9 = sld [smem:[#allocation2 + $0x29]] }
  0xe2   : > { %1198 = vrot.lane.b32.xlu1 %v1193_v46, %s2487_s6  ;;  %1196 = vrot.lane.b32.xlu0 %v1192_v54, %s2487_s6  ;;  %v497_v46 = vrot.slane %v490_v19, 2  ;;  %v1221_v54 = vmul.f32 %v2878_v34, %v1219_v27  ;;  %v1292_v19 = vrot.slane %v1286_v30, 1  ;;  %v1306_v27 = vmul.f32 %v2882_v38, %v1305_v41  ;;  %v2373_v30 = vld [vmem:[%s2599_s25] sm:$0xff] }
  0xe3   : > { %v525_v31 = vmul.f32 %v2373_v30, %v524_v16  ;;  %v1328_v32 = vmul.f32 %v2878_v34, %v1326_v5  ;;  %v1347_v41 = vstv %s3005_s10  ;;  %v1329_v42 = vmul.f32 %v2994_v12, %v1326_v5  ;;  %s3273_s10 = sld [smem:[#allocation2 + $0x15]] }
  0xe4   : > { %v3019_v43 = vpop.permute.xlu1 %482  ;;  %v3021_v49 = vpop.permute.xlu0 %480  ;;  %v1327_v17 = vmul.f32 %v2882_v38, %v1326_v5  ;;  %v3067_v15 = vsel %vm496_vm1, %v497_v46, %v498_v50  ;;  %v1295_v16 = vsel %vm318_vm0, %v1292_v19, %v1294_v4  ;;  %v1312_v30 = vrot.slane %v1306_v27, 1 }
  0xe5   : > { %3870 = vst [vmem:[#allocation21_spill] sm:$0xff] %v3067_v15  ;;  %v1349_v5 = vmul.f32 %v2878_v34, %v1347_v41  ;;  %v534_v50 = vrot.slane %v527_v45, 2  ;;  %v531_v46 = vrot.slane %v525_v31, 2  ;;  %v1348_v4 = vmul.f32 %v2882_v38, %v1347_v41 }
  0xe6   : > { %1212 = vrot.lane.b32.xlu1 %v1207_v25, %s2487_s6  ;;  %1210 = vrot.lane.b32.xlu0 %v1206_v26, %s2487_s6  ;;  %v1336_v10 = vrot.slane %v1329_v42, 1  ;;  %v1333_v27 = vrot.slane %v1327_v17, 1 }
  0xe7   : > { %v1355_v42 = vrot.slane %v1349_v5, 1  ;;  %v3103_v17 = vsel %vm496_vm1, %v532_v51, %v534_v50 }
  0xe8   : > { %v3045_v25 = vpop.permute.xlu1 %555  ;;  %v3047_v26 = vpop.permute.xlu0 %553  ;;  %3877 = vst [vmem:[#allocation28_spill] sm:$0xff] %v3103_v17  ;;  %v1524_v17 = vstv %s3111_s30  ;;  %s3409_s30 = sld [smem:[#allocation2 + $0x4d]] }
  0xe9   : > { %3868 = vst [vmem:[#allocation19_spill] sm:$0xff] %v3045_v25  ;;  %3869 = vst [vmem:[#allocation20_spill] sm:$0xff] %v3047_v26  ;;  %v1350_v26 = vmul.f32 %v2994_v12, %v1347_v41  ;;  %v1368_v25 = vstv %s3030_s11  ;;  %v3091_v41 = vsel %vm496_vm1, %v515_v0, %v517_v23  ;;  %v1354_v23 = vrot.slane %v1348_v4, 1  ;;  %s3336_s11 = sld [smem:[#allocation2 + $0x16]] }
  0xea   : > { %1226 = vrot.lane.b32.xlu1 %v1221_v54, %s2487_s6  ;;  %1224 = vrot.lane.b32.xlu0 %v1220_v2, %s2487_s6  ;;  %v1293_v54 = vsel %vm318_vm0, %v1291_v52, %v1292_v19  ;;  %v1316_v52 = vsel %vm318_vm0, %v1313_v55, %v1315_v56  ;;  %v1334_v19 = vrot.slane %v1328_v32, 1  ;;  %v1370_v3 = vmul.f32 %v2878_v34, %v1368_v25 }
  0xeb   : > { %v1371_v45 = vmul.f32 %v2994_v12, %v1368_v25  ;;  %v1369_v31 = vmul.f32 %v2882_v38, %v1368_v25  ;;  %3873 = vst [vmem:[#allocation24_spill] sm:$0xff] %v3091_v41  ;;  %v3106_v25 = vsel %vm496_vm1, %v531_v46, %v532_v51  ;;  %v1482_v46 = vstv %s3071_s24  ;;  %s3379_s24 = sld [smem:[#allocation2 + $0x22]] }
  0xec   : > { %v3073_v2 = vpop.permute.xlu1 %576  ;;  %v3075_v11 = vpop.permute.xlu0 %574  ;;  %3878 = vst [vmem:[#allocation29_spill] sm:$0xff] %v3106_v25  ;;  %v1376_v5 = vrot.slane %v1370_v3, 1 }
  0xed   : > { %3871 = vst [vmem:[#allocation22_spill] sm:$0xff] %v3073_v2  ;;  %3872 = vst [vmem:[#allocation23_spill] sm:$0xff] %v3075_v11  ;;  %v1314_v11 = vsel %vm318_vm0, %v1312_v30, %v1313_v55  ;;  %v1357_v55 = vrot.slane %v1350_v26, 1  ;;  %v1337_v26 = vsel %vm318_vm0, %v1334_v19, %v1336_v10  ;;  %v671_v30 = vstv %s3062_s19  ;;  %s3352_s19 = sld [smem:[#allocation2 + $0x4b]] }
  0xee   : > { %1298 = vrot.lane.b32.xlu1 %v1295_v16, %s2486_s27  ;;  %1296 = vrot.lane.b32.xlu0 %v1293_v54, %s2486_s27  ;;  %v3094_v16 = vsel %vm496_vm1, %v514_v1, %v515_v0  ;;  %v1389_v0 = vstv %s3056_s17  ;;  %v1335_v54 = vsel %vm318_vm0, %v1333_v27, %v1334_v19  ;;  %v1461_v1 = vstv %s3064_s20  ;;  %s3350_s17 = sld [smem:[#allocation2 + $0x17]]  ;;  %s3359_s20 = sld [smem:[#allocation2 + $0x21]] }
  0xef   : > { %3874 = vst [vmem:[#allocation25_spill] sm:$0xff] %v3094_v16  ;;  %v1378_v50 = vrot.slane %v1371_v45, 1  ;;  %v1375_v51 = vrot.slane %v1369_v31, 1  ;;  %v1358_v16 = vsel %vm318_vm0, %v1355_v42, %v1357_v55  ;;  %v1390_v10 = vmul.f32 %v2882_v38, %v1389_v0 }
  0xf0   : > { %v3096_v32 = vpop.permute.xlu1 %597  ;;  %v3098_v56 = vpop.permute.xlu0 %595  ;;  %v1356_v19 = vsel %vm318_vm0, %v1354_v23, %v1355_v42  ;;  %v3130_v27 = vmul.f32 %v2717_v6, %v671_v30  ;;  %v1463_v3 = vmul.f32 %v2878_v34, %v1461_v1  ;;  %v1464_v45 = vmul.f32 %v2994_v12, %v1461_v1 }
  0xf1   : > { %3875 = vst [vmem:[#allocation26_spill] sm:$0xff] %v3096_v32  ;;  %3876 = vst [vmem:[#allocation27_spill] sm:$0xff] %v3098_v56  ;;  %v677_v31 = vstv %s3084_s26  ;;  %v1462_v55 = vmul.f32 %v2882_v38, %v1461_v1  ;;  %v1484_v42 = vmul.f32 %v2878_v34, %v1482_v46  ;;  %v1485_v23 = vmul.f32 %v2994_v12, %v1482_v46  ;;  %s3383_s26 = sld [smem:[#allocation2 + $0x4c]] }
  0xf2   : > { %1319 = vrot.lane.b32.xlu1 %v1316_v52, %s2486_s27  ;;  %1317 = vrot.lane.b32.xlu0 %v1314_v11, %s2486_s27  ;;  %v1391_v52 = vmul.f32 %v2878_v34, %v1389_v0  ;;  %v1392_v11 = vmul.f32 %v2994_v12, %v1389_v0  ;;  %3881 = vst [vmem:[#allocation32_spill] sm:$0xff] %v3130_v27  ;;  %v1396_v56 = vrot.slane %v1390_v10, 1  ;;  %v1503_v32 = vstv %s3100_s28  ;;  %s3389_s28 = sld [smem:[#allocation2 + $0x23]] }
  0xf3   : > { %v1379_v0 = vsel %vm318_vm0, %v1376_v5, %v1378_v50  ;;  %v1377_v27 = vsel %vm318_vm0, %v1375_v51, %v1376_v5  ;;  %v3145_v41 = vmul.f32 %v2720_v8, %v671_v30  ;;  %v3154_v15 = vmul.f32 %v2717_v6, %v677_v31 }
  0xf4   : > { %v3120_v4 = vpop.permute.xlu1 %618  ;;  %v3122_v2 = vpop.permute.xlu0 %616  ;;  %v1399_v1 = vrot.slane %v1392_v11, 1  ;;  %v1469_v25 = vrot.slane %v1463_v3, 2  ;;  %v683_v50 = vstv %s3109_s29  ;;  %v1471_v30 = vrot.slane %v1464_v45, 2  ;;  %s3391_s29 = sld [smem:[#allocation2 + $0x39]] }
  0xf5   : > { %3879 = vst [vmem:[#allocation30_spill] sm:$0xff] %v3120_v4  ;;  %3880 = vst [vmem:[#allocation31_spill] sm:$0xff] %v3122_v2  ;;  %v1397_v4 = vrot.slane %v1391_v52, 1  ;;  %v1468_v5 = vrot.slane %v1462_v55, 2  ;;  %v1490_v51 = vrot.slane %v1484_v42, 2  ;;  %v1505_v11 = vmul.f32 %v2878_v34, %v1503_v32 }
  0xf6   : > { %1340 = vrot.lane.b32.xlu1 %v1337_v26, %s2486_s27  ;;  %1338 = vrot.lane.b32.xlu0 %v1335_v54, %s2486_s27  ;;  %3882 = vst [vmem:[#allocation33_spill] sm:$0xff] %v3145_v41  ;;  %v1483_v26 = vmul.f32 %v2882_v38, %v1482_v46  ;;  %3885 = vst [vmem:[#allocation36_spill] sm:$0xff] %v3154_v15  ;;  %v1492_v46 = vrot.slane %v1485_v23, 2  ;;  %v1506_v10 = vmul.f32 %v2994_v12, %v1503_v32 }
  0xf7   : > { %v1504_v3 = vmul.f32 %v2882_v38, %v1503_v32  ;;  %v3172_v45 = vmul.f32 %v2720_v8, %v677_v31  ;;  %v3175_v55 = vmul.f32 %v2878_v34, %v1524_v17  ;;  %v3178_v42 = vmul.f32 %v2717_v6, %v683_v50 }
  0xf8   : > { %v3148_v2 = vpop.permute.xlu1 %639  ;;  %v3150_v54 = vpop.permute.xlu0 %637  ;;  %v1489_v52 = vrot.slane %v1483_v26, 2  ;;  %v3181_v23 = vmul.f32 %v2720_v8, %v683_v50  ;;  %v1527_v32 = vmul.f32 %v2994_v12, %v1524_v17  ;;  %v1545_v26 = vstv %s3134_s4  ;;  %s3413_s4 = sld [smem:[#allocation2 + $0x3a]] }
  0xf9   : > { %3883 = vst [vmem:[#allocation34_spill] sm:$0xff] %v3148_v2  ;;  %3884 = vst [vmem:[#allocation35_spill] sm:$0xff] %v3150_v54  ;;  %v1493_v31 = vsel %vm496_vm1, %v1490_v51, %v1492_v46  ;;  %v1511_v50 = vrot.slane %v1505_v11, 2  ;;  %v1510_v2 = vrot.slane %v1504_v3, 2  ;;  %v238_v11 = vadd.f32 %v2799_v37, %v2914_v57 }
  0xfa   : > { %1361 = vrot.lane.b32.xlu1 %v1358_v16, %s2487_s6  ;;  %1359 = vrot.lane.b32.xlu0 %v1356_v19, %s2487_s6  ;;  %v1400_v16 = vsel %vm318_vm0, %v1397_v4, %v1399_v1  ;;  %v1398_v19 = vsel %vm318_vm0, %v1396_v56, %v1397_v4  ;;  %3886 = vst [vmem:[#allocation37_spill] sm:$0xff] %v3172_v45  ;;  %3887 = vst [vmem:[#allocation38_spill] sm:$0xff] %v3181_v23  ;;  %v1513_v45 = vrot.slane %v1506_v10, 2 }
  0xfb   : > { %v1472_v56 = vsel %vm496_vm1, %v1469_v25, %v1471_v30  ;;  %v1470_v4 = vsel %vm496_vm1, %v1468_v5, %v1469_v25  ;;  %v1491_v1 = vsel %vm496_vm1, %v1489_v52, %v1490_v51  ;;  %v3202_v25 = vmul.f32 %v2878_v34, %v1545_v26 }
  0xfc   : > { %v3165_v15 = vpop.permute.xlu1 %660  ;;  %v3167_v54 = vpop.permute.xlu0 %658  ;;  %v1548_v30 = vmul.f32 %v2994_v12, %v1545_v26  ;;  %v267_v5 = vadd.f32 %v2819_v58, %v2965_v60  ;;  %v266_v51 = vadd.f32 %v2821_v59, %v2973_v61  ;;  %v1534_v46 = vrot.slane %v1527_v32, 2 }
  0xfd   : > { %v773_v52 = vstv %s3158_s5  ;;  %v239_v10 = vadd.f32 %v2810_v48, %v2956_v35  ;;  %v1514_v59 = vsel %vm496_vm1, %v1511_v50, %v1513_v45  ;;  %v1512_v61 = vsel %vm496_vm1, %v1510_v2, %v1511_v50  ;;  %s3437_s5 = sld [smem:[#allocation2 + $0x3b]] }
  0xfe   : > { %1382 = vrot.lane.b32.xlu1 %v1379_v0, %s2487_s6  ;;  %1380 = vrot.lane.b32.xlu0 %v1377_v27, %s2487_s6  ;;  %v1532_v27 = vrot.slane %v3175_v55, 2  ;;  %v1525_v0 = vmul.f32 %v2882_v38, %v1524_v17  ;;  %v1546_v17 = vmul.f32 %v2882_v38, %v1545_v26  ;;  %v309_v58 = vadd.f32 %v2861_v28, %v267_v5  ;;  %v3890_v5 = vld [vmem:[#allocation17_spill] sm:$0xff] }
  0xff   : > { %v308_v60 = vadd.f32 %v2863_v29, %v266_v51  ;;  %v281_v37 = vadd.f32 %v2830_v7, %v239_v10  ;;  %v280_v48 = vadd.f32 %v2832_v9, %v238_v11  ;;  %v1553_v29 = vrot.slane %v3202_v25, 2 }
 0x100   : > { %v3195_v41 = vpop.permute.xlu1 %696  ;;  %v3197_v23 = vpop.permute.xlu0 %694  ;;  %v1531_v3 = vrot.slane %v1525_v0, 2  ;;  %v3231_v28 = vsel %vm496_vm1, %v1532_v27, %v1534_v46  ;;  %v1566_v2 = vstv %s3185_s7  ;;  %v1552_v7 = vrot.slane %v1546_v17, 2  ;;  %v3286_v46 = vld [vmem:[%s2599_s25 + $0x20] sm:$0xff]  ;;  %s3452_s7 = sld [smem:[#allocation2 + $0x45]] }
 0x101   : > { %v776_v9 = vmul.f32 %v2739_v22, %v773_v52  ;;  %v774_v45 = vmul.f32 %v2720_v8, %v773_v52  ;;  %v3240_v55 = vstv %s3192_s8  ;;  %v253_v32 = vadd.f32 %v2808_v47, %v2954_v33  ;;  %s3459_s8 = sld [smem:[#allocation2 + $0x46]] }
 0x102   : > { %1403 = vrot.lane.b32.xlu1 %v1400_v16, %s2487_s6  ;;  %1401 = vrot.lane.b32.xlu0 %v1398_v19, %s2487_s6  ;;  %v3228_v16 = vmul.f32 %v2717_v6, %v773_v52  ;;  %v1555_v19 = vrot.slane %v1548_v30, 2  ;;  %v252_v6 = vadd.f32 %v2797_v36, %v2907_v53  ;;  %v361_v26 = vadd.f32 %v3001_v18, %v309_v58  ;;  %v3889_v30 = vld [vmem:[#allocation14_spill] sm:$0xff]  ;;  %v3891_v58 = vld [vmem:[#allocation11_spill] sm:$0xff] }
 0x103   : > { %v326_v22 = vadd.f32 %v2979_v63, %v280_v48  ;;  %v3258_v25 = vmul.f32 %v2878_v34, %v1566_v2  ;;  %v295_v36 = vadd.f32 %v2847_v20, %v253_v32  ;;  %v783_v18 = vrot.slane %v776_v9, 1  ;;  %v3893_v48 = vld [vmem:[#allocation28_spill] sm:$0xff] }
 0x104   : > { %v3223_v57 = vpop.permute.xlu1 %710  ;;  %v3225_v35 = vpop.permute.xlu0 %708  ;;  %v781_v0 = vrot.slane %v3228_v16, 1  ;;  %v294_v47 = vadd.f32 %v2849_v21, %v252_v6  ;;  %v424_v53 = vadd.f32 %v2931_v13, %v361_v26  ;;  %v1569_v34 = vmul.f32 %v2994_v12, %v1566_v2  ;;  %v3894_v16 = vld [vmem:[#allocation29_spill] sm:$0xff]  ;;  %v3313_v6 = vld [vmem:[%s2599_s25 + $0x28] sm:$0x3]  ;;  %v3897_v26 = vld [vmem:[#allocation15_spill] sm:$0xff] }
 0x105   : > { %v381_v63 = vadd.f32 %v2888_v40, %v326_v22  ;;  %v1533_v13 = vsel %vm496_vm1, %v1531_v3, %v1532_v27  ;;  %v3888_v40 = vld [vmem:[#allocation13_spill] sm:$0xff]  ;;  %v1554_v12 = vsel %vm496_vm1, %v1552_v7, %v1553_v29  ;;  %v1567_v51 = vmul.f32 %v2882_v38, %v1566_v2 }
 0x106   : > { %1475 = vrot.lane.b32.xlu1 %v1472_v56, %s2486_s27  ;;  %1473 = vrot.lane.b32.xlu0 %v1470_v4, %s2486_s27  ;;  %v360_v56 = vadd.f32 %v3008_v24, %v308_v60  ;;  %v327_v4 = vadd.f32 %v2976_v62, %v281_v37  ;;  %v487_v20 = vadd.f32 %v3019_v43, %v424_v53  ;;  %v780_v43 = vrot.slane %v774_v45, 1  ;;  %v3892_v60 = vld [vmem:[#allocation12_spill] sm:$0xff] }
 0x107   : > { %v444_v24 = vadd.f32 %v3888_v40, %v381_v63  ;;  %v343_v27 = vadd.f32 %v3890_v5, %v294_v47  ;;  %v3295_v52 = vsel %vm318_vm0, %v781_v0, %v783_v18  ;;  %v1574_v11 = vrot.slane %v3258_v25, 2  ;;  %v3899_v25 = vld [vmem:[#allocation26_spill] sm:$0xff]  ;;  %v3900_v47 = vld [vmem:[#allocation27_spill] sm:$0xff]  ;;  %v3333_v40 = vld [vmem:[%s2599_s25 + $0x50] sm:$0xff] }
 0x108   : > { %v3252_v50 = vpop.permute.xlu1 %724  ;;  %v3254_v8 = vpop.permute.xlu0 %722  ;;  %v423_v33 = vadd.f32 %v2933_v14, %v360_v56  ;;  %v382_v62 = vadd.f32 %v2886_v39, %v327_v4  ;;  %v1556_v14 = vsel %vm496_vm1, %v1553_v29, %v1555_v19  ;;  %v1576_v10 = vrot.slane %v1569_v34, 2  ;;  %v3895_v19 = vld [vmem:[#allocation18_spill] sm:$0xff]  ;;  %v3898_v4 = vld [vmem:[#allocation16_spill] sm:$0xff] }
 0x109   : > { %v807_v17 = vstv %s3242_s9  ;;  %v402_v37 = vadd.f32 %v3892_v60, %v343_v27  ;;  %v539_v3 = vadd.f32 %v3893_v48, %v487_v20  ;;  %v3310_v45 = vsel %vm318_vm0, %v780_v43, %v781_v0  ;;  %v3902_v0 = vld [vmem:[#allocation20_spill] sm:$0xff]  ;;  %v3903_v43 = vld [vmem:[#allocation30_spill] sm:$0xff]  ;;  %s3468_s9 = sld [smem:[#allocation2 + $0x47]] }
 0x10a   : > { %1496 = vrot.lane.b32.xlu1 %v1493_v31, %s2486_s27  ;;  %1494 = vrot.lane.b32.xlu0 %v1491_v1, %s2486_s27  ;;  %v486_v21 = vadd.f32 %v3021_v49, %v423_v33  ;;  %v445_v39 = vadd.f32 %v2958_v44, %v382_v62  ;;  %v344_v49 = vadd.f32 %v3889_v30, %v295_v36  ;;  %v3901_v33 = vld [vmem:[#allocation19_spill] sm:$0xff]  ;;  %v1573_v18 = vrot.slane %v1567_v51, 2  ;;  %v3342_v51 = vld [vmem:[%s2599_s25 + $0x18] sm:$0xff] }
 0x10b   : > { %v3290_v44 = vmul.f32 %v3286_v46, %v3240_v55  ;;  %v3317_v32 = vmul.f32 %v3313_v6, %v3240_v55  ;;  %v465_v22 = vadd.f32 %v3898_v4, %v402_v37  ;;  %v602_v36 = vadd.f32 %v3899_v25, %v539_v3 }
 0x10c   : > { %v3277_v31 = vpop.permute.xlu1 %738  ;;  %v3279_v1 = vpop.permute.xlu0 %736  ;;  %v403_v38 = vadd.f32 %v3891_v58, %v344_v49  ;;  %v538_v29 = vadd.f32 %v3894_v16, %v486_v21  ;;  %v505_v2 = vadd.f32 %v3895_v19, %v445_v39  ;;  %v809_v34 = vmul.f32 %v3286_v46, %v807_v17  ;;  %v3904_v49 = vld [vmem:[#allocation31_spill] sm:$0xff] }
 0x10d   : > { %v665_v20 = vadd.f32 %v3165_v15, %v602_v36  ;;  %v1577_v39 = vsel %vm496_vm1, %v1574_v11, %v1576_v10  ;;  %v810_v27 = vmul.f32 %v3313_v6, %v807_v17  ;;  %v808_v15 = vmul.f32 %v3342_v51, %v807_v17  ;;  %v3906_v10 = vld [vmem:[#allocation25_spill] sm:$0xff]  ;;  %v3912_v36 = vld [vmem:[#allocation34_spill] sm:$0xff] }
 0x10e   : > { %1517 = vrot.lane.b32.xlu1 %v1514_v59, %s2486_s27  ;;  %1515 = vrot.lane.b32.xlu0 %v1512_v61, %s2486_s27  ;;  %v3896_v59 = vld [vmem:[#allocation21_spill] sm:$0xff]  ;;  %v466_v56 = vadd.f32 %v3897_v26, %v403_v38  ;;  %v601_v53 = vadd.f32 %v3900_v47, %v538_v29  ;;  %v560_v62 = vadd.f32 %v3901_v33, %v505_v2  ;;  %v798_v60 = vrot.slane %v3290_v44, 1  ;;  %v3907_v44 = vld [vmem:[#allocation22_spill] sm:$0xff] }
 0x10f   : > { %v504_v7 = vadd.f32 %v3896_v59, %v444_v24  ;;  %v1609_v24 = vstv %s3273_s10  ;;  %v521_v38 = vadd.f32 %v3906_v10, %v465_v22  ;;  %v791_v37 = vmul.f32 %v3342_v51, %v3240_v55  ;;  %v3908_v55 = vld [vmem:[#allocation23_spill] sm:$0xff]  ;;  %v3909_v59 = vld [vmem:[#allocation38_spill] sm:$0xff]  ;;  %s3482_s10 = sld [smem:[#allocation2 + $0x5d]] }
 0x110   : > { %v3305_v61 = vpop.permute.xlu1 %752  ;;  %v3307_v9 = vpop.permute.xlu0 %750  ;;  %v664_v21 = vadd.f32 %v3167_v54, %v601_v53  ;;  %v623_v30 = vadd.f32 %v3903_v43, %v560_v62  ;;  %v3905_v54 = vld [vmem:[#allocation24_spill] sm:$0xff]  ;;  %v1575_v17 = vsel %vm496_vm1, %v1573_v18, %v1574_v11  ;;  %v800_v48 = vrot.slane %v3317_v32, 1  ;;  %v3911_v11 = vld [vmem:[#allocation33_spill] sm:$0xff]  ;;  %v3913_v53 = vld [vmem:[#allocation35_spill] sm:$0xff] }
 0x111   : > { %v559_v63 = vadd.f32 %v3902_v0, %v504_v7  ;;  %v522_v58 = vadd.f32 %v3905_v54, %v466_v56  ;;  %v1611_v3 = vmul.f32 %v3333_v40, %v1609_v24  ;;  %v815_v16 = vrot.slane %v809_v34, 1 }
 0x112   : > { %1538 = vrot.lane.b32.xlu1 %v3231_v28, %s2487_s6  ;;  %1536 = vrot.lane.b32.xlu0 %v1533_v13, %s2487_s6  ;;  %v580_v19 = vadd.f32 %v3908_v55, %v521_v38  ;;  %v687_v2 = vadd.f32 %v3178_v42, %v665_v20  ;;  %v686_v7 = vadd.f32 %v3909_v59, %v664_v21  ;;  %v817_v22 = vrot.slane %v810_v27, 1 }
 0x113   : > { %v622_v28 = vadd.f32 %v3904_v49, %v559_v63  ;;  %v581_v29 = vadd.f32 %v3907_v44, %v522_v58  ;;  %v814_v25 = vrot.slane %v808_v15, 1  ;;  %v797_v18 = vrot.slane %v791_v37, 1  ;;  %v3914_v49 = vld [vmem:[#allocation36_spill] sm:$0xff] }
 0x114   : > { %v767_v5 = vpop.permute.xlu1 %766  ;;  %v765_v13 = vpop.permute.xlu0 %764  ;;  %v643_v33 = vadd.f32 %v3913_v53, %v580_v19  ;;  %v729_v62 = vadd.f32 %v3252_v50, %v687_v2  ;;  %v728_v42 = vadd.f32 %v3254_v8, %v686_v7  ;;  %v801_v50 = vsel %vm318_vm0, %v798_v60, %v800_v48 }
 0x115   : > { %v674_v56 = vadd.f32 %v3911_v11, %v622_v28  ;;  %v644_v47 = vadd.f32 %v3912_v36, %v581_v29  ;;  %v1623_v8 = vstv %s3336_s11  ;;  %v1637_v27 = vstv %s3350_s17  ;;  %s3487_s11 = sld [smem:[#allocation2 + $0x6]]  ;;  %s3491_s17 = sld [smem:[#allocation2 + $0x7]] }
 0x116   : > { %1559 = vrot.lane.b32.xlu1 %v1556_v14, %s2487_s6  ;;  %1557 = vrot.lane.b32.xlu0 %v1554_v12, %s2487_s6  ;;  %v3366_v14 = vld [vmem:[%s2599_s25 + $0x48] sm:$0xff]  ;;  %v771_v20 = vadd.f32 %v767_v5, %v729_v62  ;;  %v770_v21 = vadd.f32 %v765_v13, %v728_v42  ;;  %v3915_v5 = vld [vmem:[#allocation37_spill] sm:$0xff]  ;;  %v950_v15 = vstv %s3352_s19  ;;  %v1639_v44 = vmul.f32 %v3333_v40, %v1637_v27  ;;  %s3501_s19 = sld [smem:[#allocation2 + $0x5e]] }
 0x117   : > { %v3910_v12 = vld [vmem:[#allocation32_spill] sm:$0xff]  ;;  %v700_v63 = vadd.f32 %v3197_v23, %v674_v56  ;;  %v1610_v34 = vmul.f32 %v3366_v14, %v1609_v24  ;;  %v818_v24 = vsel %vm318_vm0, %v815_v16, %v817_v22  ;;  %v681_v28 = vadd.f32 %v3914_v49, %v644_v47 }
 0x118   : > { %v675_v26 = vadd.f32 %v3910_v12, %v623_v30  ;;  %v839_v32 = vpop.permute.xlu1 %838  ;;  %v837_v4 = vpop.permute.xlu0 %836  ;;  %v816_v30 = vsel %vm318_vm0, %v814_v25, %v815_v16  ;;  %v680_v13 = vadd.f32 %v3915_v5, %v643_v33  ;;  %v1624_v54 = vmul.f32 %v3366_v14, %v1623_v8 }
 0x119   : > { %v742_v23 = vadd.f32 %v3279_v1, %v700_v63  ;;  %v1625_v1 = vmul.f32 %v3333_v40, %v1623_v8  ;;  %v1651_v58 = vstv %s3359_s20  ;;  %v715_v10 = vadd.f32 %v3223_v57, %v681_v28  ;;  %v3432_v63 = vld [vmem:[%s2599_s25 + $0x58] sm:$0x3]  ;;  %s3506_s20 = sld [smem:[#allocation2 + $0x8]] }
 0x11a   : > { %v701_v0 = vadd.f32 %v3195_v41, %v675_v26  ;;  %1580 = vrot.lane.b32.xlu1 %v1577_v39, %s2487_s6  ;;  %1578 = vrot.lane.b32.xlu0 %v1575_v17, %s2487_s6  ;;  %v714_v38 = vadd.f32 %v3225_v35, %v680_v13  ;;  %v822_v37 = vadd.f32 %v818_v24, %v771_v20  ;;  %v1665_v2 = vstv %s3379_s24  ;;  %s3512_s24 = sld [smem:[#allocation2 + $0x5f]] }
 0x11b   : > { %v821_v17 = vadd.f32 %v816_v30, %v770_v21  ;;  %v952_v29 = vmul.f32 %v3286_v46, %v950_v15  ;;  %v757_v57 = vadd.f32 %v3305_v61, %v715_v10  ;;  %v953_v59 = vmul.f32 %v3313_v6, %v950_v15 }
 0x11c   : > { %v743_v41 = vadd.f32 %v3277_v31, %v701_v0  ;;  %v860_v39 = vpop.permute.xlu1 %859  ;;  %v858_v43 = vpop.permute.xlu0 %857  ;;  %v799_v31 = vsel %vm318_vm0, %v797_v18, %v798_v60  ;;  %v787_v60 = vadd.f32 %v3310_v45, %v742_v23  ;;  %v756_v35 = vadd.f32 %v3307_v9, %v714_v38 }
 0x11d   : > { %v1653_v45 = vmul.f32 %v3333_v40, %v1651_v58  ;;  %v951_v9 = vmul.f32 %v3342_v51, %v950_v15  ;;  %v967_v12 = vstv %s3383_s26  ;;  %v1652_v56 = vmul.f32 %v3366_v14, %v1651_v58  ;;  %s3519_s26 = sld [smem:[#allocation2 + $0x69]] }
 0x11e   : > { %1616 = vrot.lane.b32.xlu1 %v1611_v3, %s2486_s27  ;;  %1614 = vrot.lane.b32.xlu0 %v1610_v34, %s2486_s27  ;;  %v788_v48 = vadd.f32 %v3295_v52, %v743_v41  ;;  %v1638_v52 = vmul.f32 %v3366_v14, %v1637_v27  ;;  %v842_v7 = vadd.f32 %v837_v4, %v787_v60  ;;  %v958_v22 = vrot.slane %v952_v29, 2 }
 0x11f   : > { %v1679_v25 = vstv %s3389_s28  ;;  %v1744_v36 = vstv %s3391_s29  ;;  %v805_v47 = vadd.f32 %v801_v50, %v757_v57  ;;  %v804_v53 = vadd.f32 %v799_v31, %v756_v35  ;;  %s3539_s28 = sld [smem:[#allocation2 + $0x6a]] }
 0x120   : > { %v881_v16 = vpop.permute.xlu1 %880  ;;  %v879_v3 = vpop.permute.xlu0 %878  ;;  %v843_v61 = vadd.f32 %v839_v32, %v788_v48  ;;  %v960_v32 = vrot.slane %v953_v59, 2  ;;  %v969_v4 = vmul.f32 %v3286_v46, %v967_v12  ;;  %v970_v42 = vmul.f32 %v3313_v6, %v967_v12  ;;  %s3548_s29 = sld [smem:[#allocation2 + $0x2a]] }
 0x121   : > { %v885_v55 = vadd.f32 %v881_v16, %v822_v37  ;;  %v884_v19 = vadd.f32 %v879_v3, %v821_v17  ;;  %v968_v0 = vmul.f32 %v3342_v51, %v967_v12  ;;  %v864_v18 = vadd.f32 %v860_v39, %v805_v47 }
 0x122   : > { %1630 = vrot.lane.b32.xlu1 %v1625_v1, %s2486_s27  ;;  %1628 = vrot.lane.b32.xlu0 %v1624_v54, %s2486_s27  ;;  %v863_v34 = vadd.f32 %v858_v43, %v804_v53  ;;  %v957_v20 = vrot.slane %v951_v9, 2  ;;  %v3435_v21 = vmul.f32 %v3333_v40, %v1744_v36  ;;  %v1667_v41 = vmul.f32 %v3333_v40, %v1665_v2 }
 0x123   : > { %v1666_v23 = vmul.f32 %v3366_v14, %v1665_v2  ;;  %v1681_v24 = vmul.f32 %v3333_v40, %v1679_v25  ;;  %v984_v30 = vstv %s3409_s30  ;;  %v1747_v39 = vmul.f32 %v3432_v63, %v1744_v36  ;;  %s3560_s30 = sld [smem:[#allocation2 + $0x6b]] }
 0x124   : > { %v902_v26 = vpop.permute.xlu1 %901  ;;  %v900_v11 = vpop.permute.xlu0 %899  ;;  %v1765_v43 = vstv %s3413_s4  ;;  %v975_v5 = vrot.slane %v969_v4, 2  ;;  %v977_v13 = vrot.slane %v970_v42, 2  ;;  %v974_v27 = vrot.slane %v968_v0, 2  ;;  %s3564_s4 = sld [smem:[#allocation2 + $0x2b]] }
 0x125   : > { %v906_v33 = vadd.f32 %v902_v26, %v843_v61  ;;  %v905_v62 = vadd.f32 %v900_v11, %v842_v7  ;;  %v1745_v15 = vmul.f32 %v3366_v14, %v1744_v36  ;;  %v961_v31 = vsel %vm496_vm1, %v958_v22, %v960_v32 }
 0x126   : > { %1644 = vrot.lane.b32.xlu1 %v1639_v44, %s2486_s27  ;;  %1642 = vrot.lane.b32.xlu0 %v1638_v52, %s2486_s27  ;;  %v959_v1 = vsel %vm496_vm1, %v957_v20, %v958_v22  ;;  %v1752_v54 = vrot.slane %v3435_v21, 1  ;;  %v986_v58 = vmul.f32 %v3286_v46, %v984_v30  ;;  %v987_v37 = vmul.f32 %v3313_v6, %v984_v30 }
 0x127   : > { %v985_v17 = vmul.f32 %v3342_v51, %v984_v30  ;;  %v1767_v48 = vmul.f32 %v3333_v40, %v1765_v43  ;;  %v1768_v60 = vmul.f32 %v3432_v63, %v1765_v43  ;;  %v1754_v44 = vrot.slane %v1747_v39, 1 }
 0x128   : > { %v923_v50 = vpop.permute.xlu1 %922  ;;  %v921_v8 = vpop.permute.xlu0 %920  ;;  %v1766_v29 = vmul.f32 %v3366_v14, %v1765_v43  ;;  %v1680_v46 = vmul.f32 %v3366_v14, %v1679_v25  ;;  %v978_v6 = vsel %vm496_vm1, %v975_v5, %v977_v13  ;;  %v976_v51 = vsel %vm496_vm1, %v974_v27, %v975_v5 }
 0x129   : > { %v927_v49 = vadd.f32 %v923_v50, %v864_v18  ;;  %v926_v28 = vadd.f32 %v921_v8, %v863_v34  ;;  %v1751_v57 = vrot.slane %v1745_v15, 1  ;;  %v965_v35 = vadd.f32 %v961_v31, %v906_v33 }
 0x12a   : > { %1658 = vrot.lane.b32.xlu1 %v1653_v45, %s2487_s6  ;;  %1656 = vrot.lane.b32.xlu0 %v1652_v56, %s2487_s6  ;;  %v964_v52 = vadd.f32 %v959_v1, %v905_v62  ;;  %v994_v59 = vrot.slane %v987_v37, 2  ;;  %v991_v61 = vrot.slane %v985_v17, 2  ;;  %v1773_v7 = vrot.slane %v1767_v48, 1 }
 0x12b   : > { %v1775_v9 = vrot.slane %v1768_v60, 1  ;;  %v1755_v11 = vsel %vm318_vm0, %v1752_v54, %v1754_v44  ;;  %v1772_v56 = vrot.slane %v1766_v29, 1  ;;  %v982_v47 = vadd.f32 %v978_v6, %v927_v49 }
 0x12c   : > { %v944_v10 = vpop.permute.xlu1 %943  ;;  %v942_v38 = vpop.permute.xlu0 %941  ;;  %v981_v53 = vadd.f32 %v976_v51, %v926_v28  ;;  %v1753_v33 = vsel %vm318_vm0, %v1751_v57, %v1752_v54  ;;  %v1807_v62 = vstv %s3452_s7  ;;  %v1828_v50 = vstv %s3459_s8  ;;  %s2254_s7 = sld [smem:[#allocation2 + $0x4f]]  ;;  %s2255_s8 = sld [smem:[#allocation2 + $0x50]] }
 0x12d   : > { %v948_v16 = vadd.f32 %v944_v10, %v885_v55  ;;  %v947_v3 = vadd.f32 %v942_v38, %v884_v19  ;;  %v992_v55 = vrot.slane %v986_v58, 2  ;;  %v1786_v19 = vstv %s3437_s5  ;;  %s3576_s5 = sld [smem:[#allocation2 + $0x2c]] }
 0x12e   : > { %1672 = vrot.lane.b32.xlu1 %v1667_v41, %s2487_s6  ;;  %1670 = vrot.lane.b32.xlu0 %v1666_v23, %s2487_s6  ;;  %v1788_v22 = vmul.f32 %v3333_v40, %v1786_v19  ;;  %v1789_v25 = vmul.f32 %v3432_v63, %v1786_v19  ;;  %v1787_v36 = vmul.f32 %v3366_v14, %v1786_v19  ;;  %v1849_v31 = vstv %s3468_s9  ;;  %s2265_s9 = sld [smem:[#allocation2 + $0x9]] }
 0x12f   : > { %v995_v42 = vsel %vm496_vm1, %v992_v55, %v994_v59  ;;  %v993_v0 = vsel %vm496_vm1, %v991_v61, %v992_v55  ;;  %v1776_v18 = vsel %vm318_vm0, %v1773_v7, %v1775_v9  ;;  %v1774_v21 = vsel %vm318_vm0, %v1772_v56, %v1773_v7  ;;  %v3524_v56 = vld [vmem:[%s2599_s25 + $0x38] sm:$0xff] }
 0x130   : > { %v1016_v45 = vpop.permute.xlu1 %1015  ;;  %v1014_v2 = vpop.permute.xlu0 %1013  ;;  %v1794_v8 = vrot.slane %v1788_v22, 1  ;;  %v1796_v41 = vrot.slane %v1789_v25, 1  ;;  %v1793_v23 = vrot.slane %v1787_v36, 1  ;;  %v999_v30 = vadd.f32 %v995_v42, %v948_v16  ;;  %v3528_v25 = vld [vmem:[%s2599_s25 + $0x30] sm:$0xff] }
 0x131   : > { %v1020_v12 = vadd.f32 %v1016_v45, %v965_v35  ;;  %v1019_v26 = vadd.f32 %v1014_v2, %v964_v52  ;;  %v998_v49 = vadd.f32 %v993_v0, %v947_v3  ;;  %v1810_v28 = vmul.f32 %v3432_v63, %v1807_v62 }
 0x132   : > { %1686 = vrot.lane.b32.xlu1 %v1681_v24, %s2487_s6  ;;  %1684 = vrot.lane.b32.xlu0 %v1680_v46, %s2487_s6  ;;  %v1809_v24 = vmul.f32 %v3333_v40, %v1807_v62  ;;  %v1808_v39 = vmul.f32 %v3366_v14, %v1807_v62  ;;  %v1830_v15 = vmul.f32 %v3333_v40, %v1828_v50  ;;  %v1921_v46 = vstv %s3482_s10  ;;  %s2266_s10 = sld [smem:[#allocation2 + $0xa]] }
 0x133   : > { %v1797_v1 = vsel %vm318_vm0, %v1794_v8, %v1796_v41  ;;  %v1831_v54 = vmul.f32 %v3432_v63, %v1828_v50  ;;  %v1829_v58 = vmul.f32 %v3366_v14, %v1828_v50  ;;  %v1795_v10 = vsel %vm318_vm0, %v1793_v23, %v1794_v8 }
 0x134   : > { %v1037_v32 = vpop.permute.xlu1 %1036  ;;  %v1035_v4 = vpop.permute.xlu0 %1034  ;;  %v1815_v38 = vrot.slane %v1809_v24, 1  ;;  %v1817_v37 = vrot.slane %v1810_v28, 1  ;;  %v1814_v17 = vrot.slane %v1808_v39, 1  ;;  %v1851_v16 = vmul.f32 %v3333_v40, %v1849_v31 }
 0x135   : > { %v1041_v34 = vadd.f32 %v1037_v32, %v982_v47  ;;  %v1040_v20 = vadd.f32 %v1035_v4, %v981_v53  ;;  %v1852_v29 = vmul.f32 %v3432_v63, %v1849_v31  ;;  %v1836_v6 = vrot.slane %v1830_v15, 1 }
 0x136   : > { %1758 = vrot.lane.b32.xlu1 %v1755_v11, %s2486_s27  ;;  %1756 = vrot.lane.b32.xlu0 %v1753_v33, %s2486_s27  ;;  %v1131_v51 = vstv %s3487_s11  ;;  %v1850_v57 = vmul.f32 %v3366_v14, %v1849_v31  ;;  %v1818_v35 = vsel %vm318_vm0, %v1815_v38, %v1817_v37  ;;  %v1816_v52 = vsel %vm318_vm0, %v1814_v17, %v1815_v38  ;;  %s3683_s11 = sld [smem:[#allocation2 + $0xb]] }
 0x137   : > { %v1838_v55 = vrot.slane %v1831_v54, 1  ;;  %v1835_v19 = vrot.slane %v1829_v58, 1  ;;  %v1137_v59 = vstv %s3491_s17  ;;  %v1923_v61 = vmul.f32 %v3333_v40, %v1921_v46  ;;  %s2275_s17 = sld [smem:[#allocation2 + $0x2e]] }
 0x138   : > { %v1058_v43 = vpop.permute.xlu1 %1057  ;;  %v1056_v5 = vpop.permute.xlu0 %1055  ;;  %v1924_v7 = vmul.f32 %v3432_v63, %v1921_v46  ;;  %v1859_v11 = vrot.slane %v1852_v29, 1  ;;  %v1133_v22 = vmul.f32 %v3524_v56, %v1131_v51  ;;  %v1132_v36 = vmul.f32 %v3528_v25, %v1131_v51 }
 0x139   : > { %v1062_v13 = vadd.f32 %v1058_v43, %v999_v30  ;;  %v1061_v27 = vadd.f32 %v1056_v5, %v998_v49  ;;  %v1856_v47 = vrot.slane %v1850_v57, 1  ;;  %v1839_v53 = vsel %vm318_vm0, %v1836_v6, %v1838_v55 }
 0x13a   : > { %1779 = vrot.lane.b32.xlu1 %v1776_v18, %s2486_s27  ;;  %1777 = vrot.lane.b32.xlu0 %v1774_v21, %s2486_s27  ;;  %v1837_v33 = vsel %vm318_vm0, %v1835_v19, %v1836_v6  ;;  %v1922_v62 = vmul.f32 %v3366_v14, %v1921_v46  ;;  %v1942_v32 = vstv %s3501_s19  ;;  %v1139_v0 = vmul.f32 %v3524_v56, %v1137_v59  ;;  %s2276_s19 = sld [smem:[#allocation2 + $0x2f]] }
 0x13b   : > { %v1138_v18 = vmul.f32 %v3528_v25, %v1137_v59  ;;  %v1143_v41 = vstv %s3506_s20  ;;  %v1944_v24 = vmul.f32 %v3333_v40, %v1942_v32  ;;  %v1945_v30 = vmul.f32 %v3432_v63, %v1942_v32  ;;  %s2283_s20 = sld [smem:[#allocation2 + $0x51]] }
 0x13c   : > { %v1079_v48 = vpop.permute.xlu1 %1078  ;;  %v1077_v60 = vpop.permute.xlu0 %1076  ;;  %v1963_v49 = vstv %s3512_s24  ;;  %v1928_v43 = vrot.slane %v1922_v62, 2  ;;  %v1943_v5 = vmul.f32 %v3366_v14, %v1942_v32  ;;  %v1145_v31 = vmul.f32 %v3524_v56, %v1143_v41  ;;  %s3699_s24 = sld [smem:[#allocation2 + $0x52]] }
 0x13d   : > { %v1083_v3 = vadd.f32 %v1079_v48, %v1020_v12  ;;  %v1082_v44 = vadd.f32 %v1077_v60, %v1019_v26  ;;  %v1857_v26 = vrot.slane %v1851_v16, 1  ;;  %v1984_v38 = vstv %s3519_s26  ;;  %s3733_s26 = sld [smem:[#allocation2 + $0x53]] }
 0x13e   : > { %1800 = vrot.lane.b32.xlu1 %v1797_v1, %s2486_s27  ;;  %1798 = vrot.lane.b32.xlu0 %v1795_v10, %s2486_s27  ;;  %v1144_v1 = vmul.f32 %v3528_v25, %v1143_v41  ;;  %v1965_v10 = vmul.f32 %v3333_v40, %v1963_v49  ;;  %v1950_v37 = vrot.slane %v1944_v24, 2  ;;  %v1952_v17 = vrot.slane %v1945_v30, 2 }
 0x13f   : > { %v1860_v8 = vsel %vm318_vm0, %v1857_v26, %v1859_v11  ;;  %v1858_v23 = vsel %vm318_vm0, %v1856_v47, %v1857_v26  ;;  %v1135_v28 = vadd.f32 %v1133_v22, %v1083_v3  ;;  %v1134_v39 = vadd.f32 %v1132_v36, %v1082_v44 }
 0x140   : > { %v1100_v45 = vpop.permute.xlu1 %1099  ;;  %v1098_v2 = vpop.permute.xlu0 %1097  ;;  %v1966_v48 = vmul.f32 %v3432_v63, %v1963_v49  ;;  %v1964_v60 = vmul.f32 %v3366_v14, %v1963_v49  ;;  %v1949_v29 = vrot.slane %v1943_v5, 2  ;;  %v1986_v51 = vmul.f32 %v3333_v40, %v1984_v38 }
 0x141   : > { %v1104_v9 = vadd.f32 %v1100_v45, %v1041_v34  ;;  %v1103_v12 = vadd.f32 %v1098_v2, %v1040_v20  ;;  %v1929_v34 = vrot.slane %v1923_v61, 2  ;;  %v1931_v20 = vrot.slane %v1924_v7, 2 }
 0x142   : > { %1821 = vrot.lane.b32.xlu1 %v1818_v35, %s2487_s6  ;;  %1819 = vrot.lane.b32.xlu0 %v1816_v52, %s2487_s6  ;;  %v1987_v57 = vmul.f32 %v3432_v63, %v1984_v38  ;;  %v1985_v55 = vmul.f32 %v3366_v14, %v1984_v38  ;;  %v2005_v19 = vstv %s3539_s28  ;;  %v1953_v45 = vsel %vm496_vm1, %v1950_v37, %v1952_v17 }
 0x143   : > { %v1932_v15 = vsel %vm496_vm1, %v1929_v34, %v1931_v20  ;;  %v1141_v16 = vadd.f32 %v1139_v0, %v1104_v9  ;;  %v1140_v3 = vadd.f32 %v1138_v18, %v1103_v12  ;;  %v1930_v44 = vsel %vm496_vm1, %v1928_v43, %v1929_v34  ;;  %v3582_v18 = vld [vmem:[%s2599_s25 + $0x40] sm:$0x3] }
 0x144   : > { %v1121_v4 = vpop.permute.xlu1 %1120  ;;  %v1119_v42 = vpop.permute.xlu0 %1118  ;;  %v1971_v2 = vrot.slane %v1965_v10, 2  ;;  %v1973_v59 = vrot.slane %v1966_v48, 2  ;;  %v1970_v61 = vrot.slane %v1964_v60, 2  ;;  %v1951_v12 = vsel %vm496_vm1, %v1949_v29, %v1950_v37 }
 0x145   : > { %v1125_v21 = vadd.f32 %v1121_v4, %v1062_v13  ;;  %v1124_v50 = vadd.f32 %v1119_v42, %v1061_v27  ;;  %v1233_v26 = vstv %s3548_s29  ;;  %v1992_v36 = vrot.slane %v1986_v51, 2 }
 0x146   : > { %1842 = vrot.lane.b32.xlu1 %v1839_v53, %s2487_s6  ;;  %1840 = vrot.lane.b32.xlu0 %v1837_v33, %s2487_s6  ;;  %v1994_v47 = vrot.slane %v1987_v57, 2  ;;  %v2007_v53 = vmul.f32 %v3333_v40, %v2005_v19  ;;  %v2008_v33 = vmul.f32 %v3432_v63, %v2005_v19  ;;  %v1991_v4 = vrot.slane %v1985_v55, 2 }
 0x147   : > { %v1147_v7 = vadd.f32 %v1145_v31, %v1125_v21  ;;  %v1146_v9 = vadd.f32 %v1144_v1, %v1124_v50  ;;  %v2006_v42 = vmul.f32 %v3366_v14, %v2005_v19  ;;  %v1235_v0 = vmul.f32 %v3524_v56, %v1233_v26 }
 0x148   : > { %v1157_v13 = vpop.permute.xlu1 %1156  ;;  %v1155_v27 = vpop.permute.xlu0 %1154  ;;  %v1236_v34 = vmul.f32 %v3582_v18, %v1233_v26  ;;  %v1974_v20 = vsel %vm496_vm1, %v1971_v2, %v1973_v59  ;;  %v1972_v21 = vsel %vm496_vm1, %v1970_v61, %v1971_v2  ;;  %v1234_v50 = vmul.f32 %v3528_v25, %v1233_v26 }
 0x149   : > { %v1161_v54 = vadd.f32 %v1157_v13, %v1135_v28  ;;  %v1160_v58 = vadd.f32 %v1155_v27, %v1134_v39  ;;  %v1995_v24 = vsel %vm496_vm1, %v1992_v36, %v1994_v47  ;;  %v2013_v30 = vrot.slane %v2007_v53, 2 }
 0x14a   : > { %1863 = vrot.lane.b32.xlu1 %v1860_v8, %s2487_s6  ;;  %1861 = vrot.lane.b32.xlu0 %v1858_v23, %s2487_s6  ;;  %v2026_v8 = vstv %s3560_s30  ;;  %v2015_v49 = vrot.slane %v2008_v33, 2  ;;  %v1250_v28 = vstv %s3564_s4  ;;  %v1993_v5 = vsel %vm496_vm1, %v1991_v4, %v1992_v36  ;;  %s2307_s30 = smul.u32 768, %s2532_s16 }
 0x14b   : > { %v2012_v13 = vrot.slane %v2006_v42, 2  ;;  %v1241_v27 = vrot.slane %v1235_v0, 1  ;;  %v2028_v31 = vmul.f32 %v3333_v40, %v2026_v8  ;;  %v2029_v1 = vmul.f32 %v3432_v63, %v2026_v8 }
 0x14c   : > { %v1171_v46 = vpop.permute.xlu1 %1170  ;;  %v1169_v6 = vpop.permute.xlu0 %1168  ;;  %v1240_v10 = vrot.slane %v1234_v50, 1  ;;  %v2027_v38 = vmul.f32 %v3366_v14, %v2026_v8  ;;  %v1251_v48 = vmul.f32 %v3528_v25, %v1250_v28 }
 0x14d   : > { %v1175_v35 = vadd.f32 %v1171_v46, %v1141_v16  ;;  %v1174_v52 = vadd.f32 %v1169_v6, %v1140_v3  ;;  %v2016_v3 = vsel %vm496_vm1, %v2013_v30, %v2015_v49  ;;  %v2014_v29 = vsel %vm496_vm1, %v2012_v13, %v2013_v30 }
 0x14e   : > { %1935 = vrot.lane.b32.xlu1 %v1932_v15, %s2486_s27  ;;  %1933 = vrot.lane.b32.xlu0 %v1930_v44, %s2486_s27  ;;  %v1243_v15 = vrot.slane %v1236_v34, 1  ;;  %v1267_v44 = vstv %s3576_s5  ;;  %v2034_v6 = vrot.slane %v2028_v31, 2  ;;  %v2036_v51 = vrot.slane %v2029_v1, 2 }
 0x14f   : > { %v1242_v57 = vsel %vm318_vm0, %v1240_v10, %v1241_v27  ;;  %v2033_v55 = vrot.slane %v2027_v38, 2  ;;  %v1257_v2 = vrot.slane %v1251_v48, 1  ;;  %v1269_v59 = vmul.f32 %v3524_v56, %v1267_v44 }
 0x150   : > { %v1185_v11 = vpop.permute.xlu1 %1184  ;;  %v1183_v22 = vpop.permute.xlu0 %1182  ;;  %v1244_v46 = vsel %vm318_vm0, %v1241_v27, %v1243_v15  ;;  %v1270_v61 = vmul.f32 %v3582_v18, %v1267_v44  ;;  %v2037_v26 = vsel %vm496_vm1, %v2034_v6, %v2036_v51 }
 0x151   : > { %v1189_v62 = vadd.f32 %v1185_v11, %v1147_v7  ;;  %v1188_v32 = vadd.f32 %v1183_v22, %v1146_v9  ;;  %v1268_v7 = vmul.f32 %v3528_v25, %v1267_v44  ;;  %v2035_v36 = vsel %vm496_vm1, %v2033_v55, %v2034_v6 }
 0x152   : > { %1956 = vrot.lane.b32.xlu1 %v1953_v45, %s2486_s27  ;;  %1954 = vrot.lane.b32.xlu0 %v1951_v12, %s2486_s27  ;;  %v1275_v42 = vrot.slane %v1269_v59, 1 }
 0x154   : > { %v1199_v41 = vpop.permute.xlu1 %1198  ;;  %v1197_v23 = vpop.permute.xlu0 %1196 }
 0x155   : > { %v1203_v39 = vadd.f32 %v1199_v41, %v1161_v54  ;;  %v1202_v43 = vadd.f32 %v1197_v23, %v1160_v58  ;;  %v1252_v54 = vmul.f32 %v3524_v56, %v1250_v28  ;;  %v1253_v58 = vmul.f32 %v3582_v18, %v1250_v28 }
 0x156   : > { %1977 = vrot.lane.b32.xlu1 %v1974_v20, %s2486_s27  ;;  %1975 = vrot.lane.b32.xlu0 %v1972_v21, %s2486_s27  ;;  %s2253_s27 = sld [smem:[#allocation2 + $0x4e]] }
 0x157   : > { %v1258_v19 = vrot.slane %v1252_v54, 1  ;;  %v1260_v45 = vrot.slane %v1253_v58, 1  ;;  %v1248_v11 = vadd.f32 %v1244_v46, %v1203_v39  ;;  %v1247_v22 = vadd.f32 %v1242_v57, %v1202_v43 }
 0x158   : > { %v1213_v37 = vpop.permute.xlu1 %1212  ;;  %v1211_v17 = vpop.permute.xlu0 %1210  ;;  %v1427_v54 = vstv %s2254_s7  ;;  %v1444_v57 = vstv %s2255_s8  ;;  %s3795_s7 = scalar_lea.hbm %s3847_s3, %s2307_s30 }
 0x159   : > { %v1217_v60 = vadd.f32 %v1213_v37, %v1175_v35  ;;  %v1216_v16 = vadd.f32 %v1211_v17, %v1174_v52  ;;  %v1261_v47 = vsel %vm318_vm0, %v1258_v19, %v1260_v45  ;;  %v1259_v4 = vsel %vm318_vm0, %v1257_v2, %v1258_v19 }
 0x15a   : > { %1998 = vrot.lane.b32.xlu1 %v1995_v24, %s2487_s6  ;;  %1996 = vrot.lane.b32.xlu0 %v1993_v5, %s2487_s6  ;;  %v1428_v46 = vmul.f32 %v3528_v25, %v1427_v54 }
 0x15b   : > { %v1265_v20 = vadd.f32 %v1261_v47, %v1217_v60  ;;  %v1264_v21 = vadd.f32 %v1259_v4, %v1216_v16  ;;  %v1429_v16 = vmul.f32 %v3524_v56, %v1427_v54 }
 0x15c   : > { %v1227_v35 = vpop.permute.xlu1 %1226  ;;  %v1225_v52 = vpop.permute.xlu0 %1224  ;;  %v1410_v39 = vstv %s2253_s27  ;;  %v1434_v59 = vrot.slane %v1428_v46, 2 }
 0x15d   : > { %v1231_v9 = vadd.f32 %v1227_v35, %v1189_v62  ;;  %v1230_v12 = vadd.f32 %v1225_v52, %v1188_v32  ;;  %v1277_v62 = vrot.slane %v1270_v61, 1  ;;  %v1274_v32 = vrot.slane %v1268_v7, 1 }
 0x15e   : > { %2019 = vrot.lane.b32.xlu1 %v2016_v3, %s2487_s6  ;;  %2017 = vrot.lane.b32.xlu0 %v2014_v29, %s2487_s6  ;;  %v1412_v15 = vmul.f32 %v3524_v56, %v1410_v39  ;;  %v1413_v31 = vmul.f32 %v3582_v18, %v1410_v39  ;;  %v1411_v1 = vmul.f32 %v3528_v25, %v1410_v39  ;;  %v1435_v45 = vrot.slane %v1429_v16, 2 }
 0x15f   : > { %v1278_v41 = vsel %vm318_vm0, %v1275_v42, %v1277_v62  ;;  %v1276_v23 = vsel %vm318_vm0, %v1274_v32, %v1275_v42  ;;  %v1430_v3 = vmul.f32 %v3582_v18, %v1427_v54  ;;  %v1446_v61 = vmul.f32 %v3524_v56, %v1444_v57 }
 0x160   : > { %v1299_v53 = vpop.permute.xlu1 %1298  ;;  %v1297_v33 = vpop.permute.xlu0 %1296  ;;  %v1282_v49 = vadd.f32 %v1278_v41, %v1231_v9  ;;  %v1281_v28 = vadd.f32 %v1276_v23, %v1230_v12  ;;  %v1418_v17 = vrot.slane %v1412_v15, 2  ;;  %v1420_v48 = vrot.slane %v1413_v31, 2 }
 0x161   : > { %v1303_v0 = vadd.f32 %v1299_v53, %v1248_v11  ;;  %v1302_v34 = vadd.f32 %v1297_v33, %v1247_v22  ;;  %v1417_v60 = vrot.slane %v1411_v1, 2  ;;  %v1437_v35 = vrot.slane %v1430_v3, 2 }
 0x162   : > { %2040 = vrot.lane.b32.xlu1 %v2037_v26, %s2487_s6  ;;  %2038 = vrot.lane.b32.xlu0 %v2035_v36, %s2487_s6  ;;  %v1421_v55 = vsel %vm496_vm1, %v1418_v17, %v1420_v48  ;;  %v1447_v7 = vmul.f32 %v3582_v18, %v1444_v57  ;;  %v1445_v9 = vmul.f32 %v3528_v25, %v1444_v57  ;;  %v1452_v4 = vrot.slane %v1446_v61, 2  ;;  %s2274_s6 = sld [smem:[#allocation2 + $0x2d]] }
 0x163   : > { %v1419_v19 = vsel %vm496_vm1, %v1417_v60, %v1418_v17  ;;  %v1438_v36 = vsel %vm496_vm1, %v1435_v45, %v1437_v35  ;;  %v1436_v33 = vsel %vm496_vm1, %v1434_v59, %v1435_v45  ;;  %v1591_v57 = vstv %s2265_s9 }
 0x164   : > { %v1320_v50 = vpop.permute.xlu1 %1319  ;;  %v1318_v8 = vpop.permute.xlu0 %1317  ;;  %v1454_v42 = vrot.slane %v1447_v7, 2  ;;  %v1451_v62 = vrot.slane %v1445_v9, 2  ;;  %v1603_v59 = vstv %s3683_s11  ;;  %v1593_v61 = vmul.f32 %v3333_v40, %v1591_v57 }
 0x165   : > { %v1324_v24 = vadd.f32 %v1320_v50, %v1265_v20  ;;  %v1323_v30 = vadd.f32 %v1318_v8, %v1264_v21  ;;  %v1592_v7 = vmul.f32 %v3366_v14, %v1591_v57  ;;  %v1710_v9 = vstv %s2275_s17 }
 0x166   : > { %v1455_v20 = vsel %vm496_vm1, %v1452_v4, %v1454_v42  ;;  %v1453_v21 = vsel %vm496_vm1, %v1451_v62, %v1452_v4  ;;  %v1870_v42 = vstv %s2283_s20 }
 0x167   : > { %v1873_v57 = vmul.f32 %v3432_v63, %v1870_v42 }
 0x168   : > { %v1341_v43 = vpop.permute.xlu1 %1340  ;;  %v1339_v5 = vpop.permute.xlu0 %1338  ;;  %v1693_v46 = vstv %s2274_s6  ;;  %s2488_s6 = smov [#allocation7]  }
 0x169   : > { %v1345_v13 = vadd.f32 %v1341_v43, %v1282_v49  ;;  %v1344_v27 = vadd.f32 %v1339_v5, %v1281_v28  ;;  %v1694_v45 = vmul.f32 %v3366_v14, %v1693_v46  ;;  %s2416_s9 = sshll.u32 %s2488_s6, 4  ;;  %s2417_s9 = int_to_ptr.vmem [resolvable:$false] %s2416_s9 }
 0x16c   : > { %v1362_v10 = vpop.permute.xlu1 %1361  ;;  %v1360_v38 = vpop.permute.xlu0 %1359 }
 0x16d   : > { %v1366_v58 = vadd.f32 %v1362_v10, %v1303_v0  ;;  %v1365_v37 = vadd.f32 %v1360_v38, %v1302_v34 }
 0x16f   : > { %v1425_v11 = vadd.f32 %v1421_v55, %v1366_v58  ;;  %v1424_v22 = vadd.f32 %v1419_v19, %v1365_v37  ;;  %v1695_v55 = vmul.f32 %v3333_v40, %v1693_v46  ;;  %v1696_v19 = vmul.f32 %v3432_v63, %v1693_v46 }
 0x170   : > { %v1383_v44 = vpop.permute.xlu1 %1382  ;;  %v1381_v29 = vpop.permute.xlu0 %1380 }
 0x171   : > { %v1387_v6 = vadd.f32 %v1383_v44, %v1324_v24  ;;  %v1386_v51 = vadd.f32 %v1381_v29, %v1323_v30 }
 0x173   : > { %v1442_v18 = vadd.f32 %v1438_v36, %v1387_v6  ;;  %v1441_v0 = vadd.f32 %v1436_v33, %v1386_v51  ;;  %v3702_v36 = vld [vmem:[%s2599_s25 + $0x50] sm:$0xff] }
 0x174   : > { %v1404_v52 = vpop.permute.xlu1 %1403  ;;  %v1402_v2 = vpop.permute.xlu0 %1401  ;;  %v1605_v33 = vmul.f32 %v3702_v36, %v1603_v59 }
 0x175   : > { %v1408_v12 = vadd.f32 %v1404_v52, %v1345_v13  ;;  %v1407_v26 = vadd.f32 %v1402_v2, %v1344_v27  ;;  %v1597_v2 = vstv %s2266_s10  ;;  %s2418_s10 = scalar_lea.vmem %s2417_s9, 1536 }
 0x177   : > { %v1459_v41 = vadd.f32 %v1455_v20, %v1408_v12  ;;  %v1458_v23 = vadd.f32 %v1453_v21, %v1407_v26  ;;  %v1701_v12 = vrot.slane %v1695_v55, 1  ;;  %v1703_v26 = vrot.slane %v1696_v19, 1 }
 0x178   : > { %v1476_v47 = vpop.permute.xlu1 %1475  ;;  %v1474_v53 = vpop.permute.xlu0 %1473  ;;  %v1871_v55 = vmul.f32 %v3366_v14, %v1870_v42 }
 0x179   : > { %v3633_v32 = vadd.f32 %v1476_v47, %v1425_v11  ;;  %v3635_v56 = vadd.f32 %v1474_v53, %v1424_v22  ;;  %v1700_v11 = vrot.slane %v1694_v45, 1  ;;  %v1727_v22 = vstv %s2276_s19 }
 0x17a   : > { %v1599_v47 = vmul.f32 %v3702_v36, %v1597_v2  ;;  %v1598_v53 = vmul.f32 %v3366_v14, %v1597_v2  ;;  %v1729_v20 = vmul.f32 %v3702_v36, %v1727_v22  ;;  %v1730_v21 = vmul.f32 %v3432_v63, %v1727_v22 }
 0x17c   : > { %v1497_v25 = vpop.permute.xlu1 %1496  ;;  %v1495_v34 = vpop.permute.xlu0 %1494 }
 0x17d   : > { %v3639_v50 = vadd.f32 %v1497_v25, %v1442_v18  ;;  %v3641_v8 = vadd.f32 %v1495_v34, %v1441_v0  ;;  %v1712_v0 = vmul.f32 %v3702_v36, %v1710_v9  ;;  %v1713_v25 = vmul.f32 %v3432_v63, %v1710_v9 }
 0x17e   : > { %v1711_v34 = vmul.f32 %v3366_v14, %v1710_v9 }
 0x17f   : > { %v1718_v2 = vrot.slane %v1712_v0, 1 }
 0x180   : > { %v1518_v24 = vpop.permute.xlu1 %1517  ;;  %v1516_v30 = vpop.permute.xlu0 %1515  ;;  %v1717_v9 = vrot.slane %v1711_v34, 1  ;;  %v2381_v34 = vld [vmem:[%s2599_s25 + $0x48] sm:$0xff]  ;;  %s188_s25 = sand.u32 1, %s2474_s13  }
 0x181   : > { %v3643_v49 = vadd.f32 %v1518_v24, %v1459_v41  ;;  %v3645_v28 = vadd.f32 %v1516_v30, %v1458_v23  ;;  %v1728_v41 = vmul.f32 %v3366_v14, %v1727_v22  ;;  %v1604_v23 = vmul.f32 %v3366_v14, %v1603_v59  ;;  %s2305_s28 = smul.u32 48, %s188_s25  ;;  %s3803_s16 = scalar_lea.sflag [#allocation3], %s188_s25 }
 0x182   : > { %v1704_v24 = vsel %vm318_vm0, %v1701_v12, %v1703_v26  ;;  %v1720_v59 = vrot.slane %v1713_v25, 1 }
 0x183   : > { %s190_s29 = scalar_lea.vmem [#allocation7], %s2305_s28 }
 0x184   : > { %v1539_v39 = vpop.permute.xlu1 %1538  ;;  %v1537_v43 = vpop.permute.xlu0 %1536  ;;  %v1721_v25 = vsel %vm318_vm0, %v1718_v2, %v1720_v59  ;;  %s2081_s4 = sshll.u32 %s190_s29, 4  ;;  %s3797_s4 = int_to_ptr.vmem [resolvable:$true] %s2081_s4 }
 0x185   : > { %v1543_v62 = vadd.f32 %v1539_v39, %v3633_v32  ;;  %v1542_v18 = vadd.f32 %v1537_v43, %v3635_v56  ;;  %v1702_v32 = vsel %vm318_vm0, %v1700_v11, %v1701_v12  ;;  %v1872_v56 = vmul.f32 %v3702_v36, %v1870_v42  ;;  %s2412_s8 = scalar_lea.vmem %s3797_s4, 768  ;;  %p2419_p8 = scmp.lt.s32.totalorder %s3797_s4, %s2417_s9 }
 0x186   : > { %v1734_v12 = vrot.slane %v1728_v41, 1  ;;  %v1887_v11 = vstv %s3699_s24  ;;  %p2413_p10 = scmp.ne.s32.totalorder %s3797_s4, %s2412_s8  ;;  %p2420_p11 = scmp.lt.s32.totalorder %s2418_s10, %s2412_s8 }
 0x187   : > { %v1595_v19 = vadd.f32 %v1593_v61, %v1543_v62  ;;  %v1594_v45 = vadd.f32 %v1592_v7, %v1542_v18  ;;  %v1878_v26 = vrot.slane %v1872_v56, 2  ;;  %v1880_v61 = vrot.slane %v1873_v57, 2 }
 0x188   : > { %v3647_v5 = vpop.permute.xlu1 %1559  ;;  %v3649_v13 = vpop.permute.xlu0 %1557  ;;  %v1877_v7 = vrot.slane %v1871_v55, 2  ;;  %v1889_v18 = vmul.f32 %v3702_v36, %v1887_v11  ;;  %v1890_v0 = vmul.f32 %v3432_v63, %v1887_v11  ;;  %p2414_p0 = pnand %p2413_p10, %p3920_p12  ;;  %p2421_p13 = por %p2420_p11, %p2419_p8 }
 0x189   : > { %v1564_v30 = vadd.f32 %v3647_v5, %v3639_v50  ;;  %v1563_v39 = vadd.f32 %v3649_v13, %v3641_v8  ;;  %v1735_v50 = vrot.slane %v1729_v20, 1  ;;  %v1737_v5 = vrot.slane %v1730_v21, 1 }
 0x18a   : > { %v1895_v57 = vrot.slane %v1889_v18, 2  ;;  %v1897_v55 = vrot.slane %v1890_v0, 2  ;;  %p2415_p7 = pneg %p2414_p0 }
 0x18b   : > { %v1601_v22 = vadd.f32 %v1599_v47, %v1564_v30  ;;  %v1881_v30 = vsel %vm496_vm1, %v1878_v26, %v1880_v61 }
 0x18c   : > { %v3651_v27 = vpop.permute.xlu1 %1580  ;;  %v3653_v15 = vpop.permute.xlu0 %1578  ;;  %p2422_p1 = pnand %p2421_p13, %p2415_p7 }
 0x18d   : > { %v1585_v42 = vadd.f32 %v3651_v27, %v3643_v49  ;;  %v1584_v62 = vadd.f32 %v3653_v15, %v3645_v28  ;;  %v1719_v49 = vsel %vm318_vm0, %v1717_v9, %v1718_v2  ;;  %v1738_v27 = vsel %vm318_vm0, %v1735_v50, %v1737_v5 }
 0x18e   : > { %v1736_v28 = vsel %vm318_vm0, %v1734_v12, %v1735_v50 }
 0x18f   : > { %v1607_v20 = vadd.f32 %v1605_v33, %v1585_v42  ;;  %v1606_v21 = vadd.f32 %v1604_v23, %v1584_v62 }
 0x190   : > { %v3655_v31 = vpop.permute.xlu1 %1616  ;;  %v3657_v1 = vpop.permute.xlu0 %1614 }
 0x191   : > { %v1621_v8 = vadd.f32 %v3655_v31, %v1595_v19  ;;  %v1620_v13 = vadd.f32 %v3657_v1, %v1594_v45 }
 0x194   : > { %v3659_v10 = vpop.permute.xlu1 %1630  ;;  %v3661_v38 = vpop.permute.xlu0 %1628 }
 0x195   : > { %v1635_v47 = vadd.f32 %v3659_v10, %v1601_v22 }
 0x198   : > { %v3663_v54 = vpop.permute.xlu1 %1644  ;;  %v3665_v58 = vpop.permute.xlu0 %1642 }
 0x199   : > { %v1649_v19 = vadd.f32 %v3663_v54, %v1607_v20 }
 0x19c   : > { %v3667_v37 = vpop.permute.xlu1 %1658  ;;  %v3669_v17 = vpop.permute.xlu0 %1656 }
 0x19d   : > { %v1663_v31 = vadd.f32 %v3667_v37, %v1621_v8  ;;  %v1662_v1 = vadd.f32 %v3669_v17, %v1620_v13 }
 0x19f   : > { %v1708_v41 = vadd.f32 %v1704_v24, %v1663_v31  ;;  %v1707_v56 = vadd.f32 %v1702_v32, %v1662_v1 }
 0x1a0   : > { %v3671_v48 = vpop.permute.xlu1 %1672  ;;  %v3673_v60 = vpop.permute.xlu0 %1670 }
 0x1a1   : > { %v1677_v15 = vadd.f32 %v3671_v48, %v1635_v47  ;;  %v1648_v48 = vadd.f32 %v3665_v58, %v1606_v21 }
 0x1a3   : > { %v1725_v2 = vadd.f32 %v1721_v25, %v1677_v15 }
 0x1a4   : > { %v3675_v16 = vpop.permute.xlu1 %1686  ;;  %v3677_v3 = vpop.permute.xlu0 %1684 }
 0x1a5   : > { %v1691_v9 = vadd.f32 %v3675_v16, %v1649_v19  ;;  %v1690_v50 = vadd.f32 %v3677_v3, %v1648_v48  ;;  %v1898_v16 = vsel %vm496_vm1, %v1895_v57, %v1897_v55 }
 0x1a8   : > { %v3679_v44 = vpop.permute.xlu1 %1758  ;;  %v3681_v29 = vpop.permute.xlu0 %1756 }
 0x1a9   : > { %v1762_v45 = vadd.f32 %v3681_v29, %v1707_v56 }
 0x1ac   : > { %v3685_v6 = vpop.permute.xlu1 %1779  ;;  %v3687_v51 = vpop.permute.xlu0 %1777 }
 0x1b0   : > { %v3692_v35 = vpop.permute.xlu1 %1800  ;;  %v3694_v52 = vpop.permute.xlu0 %1798 }
 0x1b1   : > { %3916 = vst [vmem:[#allocation13_spill] sm:$0xff] %v3692_v35  ;;  %3917 = vst [vmem:[#allocation14_spill] sm:$0xff] %v3694_v52  ;;  %v1600_v52 = vadd.f32 %v1598_v53, %v1563_v39  ;;  %v1879_v39 = vsel %vm496_vm1, %v1877_v7, %v1878_v26  ;;  %v1741_v26 = vadd.f32 %v1736_v28, %v1690_v50 }
 0x1b3   : > { %v1634_v53 = vadd.f32 %v3661_v38, %v1600_v52  ;;  %v1888_v38 = vmul.f32 %v2381_v34, %v1887_v11  ;;  %v1904_v52 = vstv %s3733_s26 }
 0x1b4   : > { %v3707_v4 = vpop.permute.xlu1 %1821  ;;  %v3709_v40 = vpop.permute.xlu0 %1819  ;;  %v1906_v59 = vmul.f32 %v3702_v36, %v1904_v52  ;;  %v1907_v29 = vmul.f32 %v3432_v63, %v1904_v52  ;;  %v1905_v12 = vmul.f32 %v2381_v34, %v1904_v52 }
 0x1b5   : > { %v1676_v37 = vadd.f32 %v3673_v60, %v1634_v53  ;;  %v1763_v60 = vadd.f32 %v3679_v44, %v1708_v41  ;;  %v1894_v24 = vrot.slane %v1888_v38, 2  ;;  %v1825_v58 = vadd.f32 %v3709_v40, %v1762_v45 }
 0x1b6   : > { %v1784_v44 = vadd.f32 %v3685_v6, %v1725_v2  ;;  %v1742_v40 = vadd.f32 %v1738_v27, %v1691_v9  ;;  %v1914_v22 = vrot.slane %v1907_v29, 2  ;;  %v1911_v63 = vrot.slane %v1905_v12, 2 }
 0x1b7   : > { %v1724_v33 = vadd.f32 %v1719_v49, %v1676_v37  ;;  %v1826_v54 = vadd.f32 %v3707_v4, %v1763_v60  ;;  %v1896_v3 = vsel %vm496_vm1, %v1894_v24, %v1895_v57  ;;  %v1884_v11 = vadd.f32 %v1879_v39, %v1825_v58 }
 0x1b8   : > { %v3727_v43 = vpop.permute.xlu1 %1842  ;;  %v3729_v46 = vpop.permute.xlu0 %1840  ;;  %v3918_v61 = vld [vmem:[#allocation13_spill] sm:$0xff] }
 0x1b9   : > { %v1783_v5 = vadd.f32 %v3687_v51, %v1724_v33  ;;  %v1847_v8 = vadd.f32 %v3727_v43, %v1784_v44  ;;  %v1885_v6 = vadd.f32 %v1881_v30, %v1826_v54  ;;  %v1912_v51 = vrot.slane %v1906_v59, 2  ;;  %v3919_v43 = vld [vmem:[#allocation14_spill] sm:$0xff] }
 0x1ba   : > { %v1805_v7 = vadd.f32 %v3918_v61, %v1742_v40  ;;  %v1804_v42 = vadd.f32 %v3919_v43, %v1741_v26 }
 0x1bb   : > { %v1846_v36 = vadd.f32 %v3729_v46, %v1783_v5  ;;  %v1902_v31 = vadd.f32 %v1898_v16, %v1847_v8  ;;  %v1915_v27 = vsel %vm496_vm1, %v1912_v51, %v1914_v22  ;;  %v1913_v28 = vsel %vm496_vm1, %v1911_v63, %v1912_v51 }
 0x1bc   : > { %v3738_v35 = vpop.permute.xlu1 %1863  ;;  %v3740_v14 = vpop.permute.xlu0 %1861 }
 0x1bd   : > { %v1901_v1 = vadd.f32 %v1896_v3, %v1846_v36  ;;  %v1868_v18 = vadd.f32 %v3738_v35, %v1805_v7  ;;  %v1867_v0 = vadd.f32 %v3740_v14, %v1804_v42 }
 0x1bf   : > { %v1919_v52 = vadd.f32 %v1915_v27, %v1868_v18  ;;  %v1918_v20 = vadd.f32 %v1913_v28, %v1867_v0 }
 0x1c0   : > { %v1936_v17 = vpop.permute.xlu1 %1935  ;;  %v1934_v10 = vpop.permute.xlu0 %1933 }
 0x1c1   : > { %v1940_v46 = vadd.f32 %v1936_v17, %v1885_v6  ;;  %v1939_v62 = vadd.f32 %v1934_v10, %v1884_v11 }
 0x1c4   : > { %v1957_v23 = vpop.permute.xlu1 %1956  ;;  %v1955_v32 = vpop.permute.xlu0 %1954 }
 0x1c5   : > { %v1961_v15 = vadd.f32 %v1957_v23, %v1902_v31  ;;  %v1960_v37 = vadd.f32 %v1955_v32, %v1901_v1 }
 0x1c8   : > { %v1978_v4 = vpop.permute.xlu1 %1977  ;;  %v1976_v13 = vpop.permute.xlu0 %1975 }
 0x1c9   : > { %v1982_v21 = vadd.f32 %v1978_v4, %v1919_v52  ;;  %v1981_v41 = vadd.f32 %v1976_v13, %v1918_v20 }
 0x1cc   : > { %v1999_v47 = vpop.permute.xlu1 %1998  ;;  %v1997_v53 = vpop.permute.xlu0 %1996 }
 0x1cd   : > { %v2003_v25 = vadd.f32 %v1999_v47, %v1940_v46  ;;  %v2002_v49 = vadd.f32 %v1997_v53, %v1939_v62 }
 0x1cf   : > { %v2293_v17 = vclamps-f32 %v2003_v25, 1.0  ;;  %v2292_v10 = vclamps-f32 %v2002_v49, 1.0 }
 0x1d0   : > { %v2020_v34 = vpop.permute.xlu1 %2019  ;;  %v2018_v38 = vpop.permute.xlu0 %2017 }
 0x1d1   : > { %2052 = vst.msk [vmem:[%s190_s29 + $0x8] sm:$0xff] %vm2050_vm2, %v2293_v17  ;;  %2051 = vst.msk [vmem:[%s190_s29] sm:$0xff] %vm2050_vm2, %v2292_v10  ;;  %v2024_v35 = vadd.f32 %v2020_v34, %v1961_v15  ;;  %v2023_v14 = vadd.f32 %v2018_v38, %v1960_v37 }
 0x1d3   : > { %v2295_v56 = vclamps-f32 %v2024_v35, 1.0  ;;  %v2294_v30 = vclamps-f32 %v2023_v14, 1.0 }
 0x1d4   : > { %v2041_v39 = vpop.permute.xlu1 %2040  ;;  %v2039_v57 = vpop.permute.xlu0 %2038 }
 0x1d5   : > { %2297 = vst.msk [vmem:[%s190_s29 + $0x18] sm:$0xff] %vm2050_vm2, %v2295_v56  ;;  %2296 = vst.msk [vmem:[%s190_s29 + $0x10] sm:$0xff] %vm2050_vm2, %v2294_v30  ;;  %v2045_v55 = vadd.f32 %v2041_v39, %v1982_v21  ;;  %v2044_v19 = vadd.f32 %v2039_v57, %v1981_v41 }
 0x1d7   : > { %v2299_v48 = vclamps-f32 %v2045_v55, 1.0  ;;  %v2298_v60 = vclamps-f32 %v2044_v19, 1.0 }
 0x1d9   : > { %2301 = vst.msk [vmem:[%s190_s29 + $0x28] sm:$0xff] %vm2050_vm2, %v2299_v48  ;;  %2300 = vst.msk [vmem:[%s190_s29 + $0x20] sm:$0xff] %vm2050_vm2, %v2298_v60 }
 0x1da   : > { %2425 = shalt.err (!%p2422_p1)
}
 0x1db   : > { %s2426_s11 = scalar_lea.hbm %s3795_s7, 768  ;;  %s2430_s20 = scalar_lea.hbm %s3847_s3, 1536 }
 0x1dc   : > { %p2427_p2 = scmp.ne.s32.totalorder %s3795_s7, %s2426_s11  ;;  %p2431_p9 = scmp.lt.u32.totalorder %s3795_s7, %s3847_s3 }
 0x1dd   : > { %p2432_p5 = scmp.lt.u32.totalorder %s2430_s20, %s2426_s11  ;;  %p2434_p10 = scmp.lt.u32.totalorder %s2426_s11, %s3795_s7 }
 0x1de   : > { %p2428_p3 = pnand %p2427_p2, %p3920_p12 }
 0x1df   : > { %p2433_p6 = por %p2432_p5, %p2431_p9 }
 0x1e0   : > { %p2429_p4 = pneg %p2428_p3 }
 0x1e1   : > { %p2435_p0 = por %p2434_p10, %p2433_p6 }
 0x1e3   : > { %p2436_p7 = pnand %p2435_p0, %p2429_p4 }
 0x1e5   : > { %2439 = shalt.err (!%p2436_p7)
}
 0x1e6   : > { %s2489_s25 = smov 128   ;;  %s2490_s28 = smov 8  }
 0x1e7   : > { %2316 = dma.vmem_to_hbm [thread:$0]  (%p3920_p12), %s3797_s4, 768, %s3795_s7, %s3803_s16, %s2489_s25, %s2489_s25, %s2490_s28  }
 0x1e8 PF: > { %p2333_p8 = scmp.ge.s32.totalorder %s2482_s15, 2  ;;  %s2096_s29 = sand.u32 1, %s2470_s12  }
 0x1e9   : > { %p3921_p11 = scmp.ne.s32.totalorder %s3852_s23, 0  ;;  %s2097_s30 = scalar_lea.sflag [#allocation3], %s2096_s29 }
 0x1eb   : > { %p2326_p13 = pnand %p2333_p8, %p3921_p11 }
 0x1ed   : > { %2465 = dma.done.wait (!%p2326_p13), %s2097_s30, 768  }
 0x1ee   : > { %2467 = vsyncadd (!%p2326_p13), %s2097_s30, 4294966528  ;;  %p15_p1 = scmp.ge.s32.totalorder %s2536_s18, 4   ;;  %s3922_s12 = smov %s2474_s13 }
 0x1ef   : > { %s3923_s13 = smov %s2478_s14  ;;  %s3924_s14 = smov %s2547_s21 }
 0x1f0   : > { %s3925_s15 = smov %s2536_s18  ;;  %17 = sbr.rel (!%p15_p1) target bundleno = 5 (0x5), region = 81 }
 0x1f7   :  { %2102 = vsyncpa [#allocation3], 1 }
 0x1f8   :  { %2104 = vsyncpa [#allocation3 + $0x1], 1 }
 0x1f9   :  { %2105 = vsyncpa [#allocation4], 1 }
 0x1fa   :  { %2107 = vsyncpa [#allocation4 + $0x1], 1 }
 0x1fb   :  { %2108 = vsyncpa [#allocation6], 1 }

</bundles_post_ra>
